<compile_context>
chip_gen: v6e
topology: v6e:2x2x1
jax: 0.10.0
libtpu: 0.0.40
codegen_flags: <defaults>
</compile_context>

<pallas_src>
import jax
import jax.numpy as jnp
from jax.experimental import pallas as pl
from jax.experimental.pallas import tpu as pltpu


def _encoder_block_kernel(x_ref, g_ref, beta_ref, b1_ref, b2_ref,
                          w1_ref, w2_ref, o_ref):
    """One (row-tile, block) grid step of the stacked pre-LN MLP encoder."""
    blk = pl.program_id(1)        # block axis: innermost, sequential carry

    # Seed the carry (output tile doubles as the running activation).
    @pl.when(blk == 0)
    def _():
        o_ref[...] = x_ref[...]

    x = o_ref[...].astype(jnp.float32)                 # (tm, D)

    g  = g_ref[blk]                                    # (1, D)
    be = beta_ref[blk]                                 # (1, D)
    b1 = b1_ref[blk]                                   # (1, H)
    b2 = b2_ref[blk]                                   # (1, D)

    # ---- LayerNorm over the feature dim (f32 on VPU/EUP) ----
    mean = jnp.mean(x, axis=-1, keepdims=True)
    var = jnp.mean((x - mean) ** 2, axis=-1, keepdims=True)
    xn = (x - mean) * jax.lax.rsqrt(var + 1e-5)
    xn = xn * g + be

    # ---- MLP: (tm,D)@(D,H) -> GELU -> (tm,H)@(H,D) ----
    # bf16 operands on the MXU, f32 accumulation.
    h = jnp.dot(xn.astype(jnp.bfloat16), w1_ref[...],
                preferred_element_type=jnp.float32) + b1
    h = jax.nn.gelu(h, approximate=True)               # tanh GELU on EUP
    y = jnp.dot(h.astype(jnp.bfloat16), w2_ref[...],
                preferred_element_type=jnp.float32) + b2

    # ---- residual; carry stays f32 in o_ref ----
    o_ref[...] = (x + y).astype(o_ref.dtype)


def _pick_row_tile(m):
    # MXU-friendly row tile; >=2 tiles at M>=512 so megacore can shard on v7x.
    if m >= 512:
        return 256
    if m >= 128:
        return 128
    return 8 * (-(-m // 8))


def encoder_forward(x, params):
    """x: (B, S, D) float32.  params: dict of per-block weights stacked on a
    leading num_blocks axis.  Returns (B, S, D)."""
    B, S, D = x.shape
    num_blocks, _, H = params["w1"].shape

    # bf16 weights: full-rate MXU on v6e/v7x, half the HBM/VMEM bytes.
    w1 = params["w1"].astype(jnp.bfloat16)                         # (NB, D, H)
    w2 = params["w2"].astype(jnp.bfloat16)                         # (NB, H, D)
    gamma = params["gamma"].reshape(num_blocks, 1, D).astype(jnp.float32)
    beta  = params["beta"].reshape(num_blocks, 1, D).astype(jnp.float32)
    b1    = params["b1"].reshape(num_blocks, 1, H).astype(jnp.float32)
    b2    = params["b2"].reshape(num_blocks, 1, D).astype(jnp.float32)

    # Flatten (B, S) -> M independent rows; pad M up to the row tile.
    M = B * S
    tm = _pick_row_tile(M)
    m_tiles = -(-M // tm)
    M_pad = m_tiles * tm
    xm = x.reshape(M, D)
    if M_pad != M:
        xm = jnp.pad(xm, ((0, M_pad - M), (0, 0)))

    grid_spec = pltpu.PrefetchScalarGridSpec(
        num_scalar_prefetch=0,
        grid=(m_tiles, num_blocks),       # block axis innermost = carry axis
        in_specs=[
            pl.BlockSpec((tm, D), lambda m, b: (m, 0)),                   # x
            pl.BlockSpec((num_blocks, 1, D), lambda m, b: (0, 0, 0)),     # gamma (resident)
            pl.BlockSpec((num_blocks, 1, D), lambda m, b: (0, 0, 0)),     # beta  (resident)
            pl.BlockSpec((num_blocks, 1, H), lambda m, b: (0, 0, 0)),     # b1    (resident)
            pl.BlockSpec((num_blocks, 1, D), lambda m, b: (0, 0, 0)),     # b2    (resident)
            pl.BlockSpec((pl.Squeezed(), D, H), lambda m, b: (b, 0, 0)),  # w1
            pl.BlockSpec((pl.Squeezed(), H, D), lambda m, b: (b, 0, 0)),  # w2
        ],
        out_specs=pl.BlockSpec((tm, D), lambda m, b: (m, 0)),  # carry over b
    )

    flops = 4 * num_blocks * M_pad * D * H                 # two matmuls / block
    transcendentals = num_blocks * M_pad * H               # GELU tanh
    bytes_accessed = (2 * M_pad * D * 4                    # x in + out
                      + (w1.size + w2.size) * 2            # bf16 weights
                      + (gamma.size + beta.size + b1.size + b2.size) * 4)
    cost = pl.CostEstimate(flops=flops, transcendentals=transcendentals,
                           bytes_accessed=bytes_accessed)

    out = pl.pallas_call(
        _encoder_block_kernel,
        out_shape=jax.ShapeDtypeStruct((M_pad, D), x.dtype),
        grid_spec=grid_spec,
        compiler_params=pltpu.CompilerParams(
            dimension_semantics=("parallel", "arbitrary"),  # m || , block carry
            vmem_limit_bytes=32 * 1024 * 1024),             # fits v7x's 64 MiB
        cost_estimate=cost,
    )(xm, gamma, beta, b1, b2, w1, w2)

    return out[:M].reshape(B, S, D)


def encoder_reference(x, params):
    """Pure-JAX reference (same bf16-operand matmuls, f32 everywhere else)."""
    num_blocks = params["w1"].shape[0]

    def block(x, i):
        g, be = params["gamma"][i], params["beta"][i]
        w1, b1 = params["w1"][i].astype(jnp.bfloat16), params["b1"][i]
        w2, b2 = params["w2"][i].astype(jnp.bfloat16), params["b2"][i]
        mean = jnp.mean(x, axis=-1, keepdims=True)
        var = jnp.mean((x - mean) ** 2, axis=-1, keepdims=True)
        xn = (x - mean) * jax.lax.rsqrt(var + 1e-5) * g + be
        h = jnp.dot(xn.astype(jnp.bfloat16), w1,
                    preferred_element_type=jnp.float32) + b1
        h = jax.nn.gelu(h, approximate=True)
        y = jnp.dot(h.astype(jnp.bfloat16), w2,
                    preferred_element_type=jnp.float32) + b2
        return x + y

    for i in range(num_blocks):
        x = block(x, i)
    return x


def init_params(key, num_blocks, d_model, d_hidden):
    ks = jax.random.split(key, 4)
    return {
        "gamma": jnp.ones((num_blocks, d_model), jnp.float32),
        "beta":  jnp.zeros((num_blocks, d_model), jnp.float32),
        "w1": 0.02 * jax.random.normal(ks[0], (num_blocks, d_model, d_hidden),
                                       jnp.float32),
        "b1": 0.01 * jax.random.normal(ks[1], (num_blocks, d_hidden),
                                       jnp.float32),
        "w2": 0.02 * jax.random.normal(ks[2], (num_blocks, d_hidden, d_model),
                                       jnp.float32),
        "b2": 0.01 * jax.random.normal(ks[3], (num_blocks, d_model),
                                       jnp.float32),
    }


if __name__ == "__main__":
    # Small but lane-dense shapes (feature dims multiples of 128, per review):
    # batch=4, seq=128, d_model=128, ffn=256, 3 blocks -> grid (2, 3).
    B, S, D, H, NUM_BLOCKS = 4, 128, 128, 256, 3

    key = jax.random.PRNGKey(0)
    kx, kp = jax.random.split(key)
    x = jax.random.normal(kx, (B, S, D), jnp.float32)
    params = init_params(kp, NUM_BLOCKS, D, H)

    out = jax.block_until_ready(encoder_forward(x, params))
    ref = encoder_reference(x, params)

    assert out.shape == (B, S, D)
    assert jnp.allclose(out, ref, atol=1e-2, rtol=1e-2), "mismatch vs reference"

    # TODO(synk): the losses=[]/artifacts=[] side-channel lists of the PyTorch
    # forward have no Pallas equivalent; blocks here are pure functions.
    print("KERNEL_OK")
</pallas_src>

<mosaic_0001>
module attributes {stable_mosaic.version = 11 : i64} {
  func.func @_encoder_block_kernel(%arg0: i32, %arg1: i32, %arg2: memref<256x128xf32, #tpu.memory_space<vmem>>, %arg3: memref<3x1x128xf32, #tpu.memory_space<vmem>>, %arg4: memref<3x1x128xf32, #tpu.memory_space<vmem>>, %arg5: memref<3x1x256xf32, #tpu.memory_space<vmem>>, %arg6: memref<3x1x128xf32, #tpu.memory_space<vmem>>, %arg7: memref<1x128x256xbf16, #tpu.memory_space<vmem>>, %arg8: memref<1x256x128xbf16, #tpu.memory_space<vmem>>, %arg9: memref<256x128xf32, #tpu.memory_space<vmem>>) attributes {dimension_semantics = [#tpu.dimension_semantics<parallel>, #tpu.dimension_semantics<arbitrary>], iteration_bounds = array<i64: 2, 3>, scalar_prefetch = 0 : i64, scratch_operands = 0 : i64, tpu.core_type = #tpu.core_type<tc>, window_params = [{transform_indices = @transform_0, window_bounds = array<i64: 256, 128>}, {pipeline_mode = #tpu.pipeline_mode<synchronous>, transform_indices = @transform_1, window_bounds = array<i64: 3, 1, 128>}, {pipeline_mode = #tpu.pipeline_mode<synchronous>, transform_indices = @transform_2, window_bounds = array<i64: 3, 1, 128>}, {pipeline_mode = #tpu.pipeline_mode<synchronous>, transform_indices = @transform_3, window_bounds = array<i64: 3, 1, 256>}, {pipeline_mode = #tpu.pipeline_mode<synchronous>, transform_indices = @transform_4, window_bounds = array<i64: 3, 1, 128>}, {transform_indices = @transform_5, window_bounds = array<i64: 1, 128, 256>}, {transform_indices = @transform_6, window_bounds = array<i64: 1, 256, 128>}, {transform_indices = @transform_7, window_bounds = array<i64: 256, 128>}]} {
    %c0_i32 = arith.constant 0 : i32
    %0 = arith.cmpi eq, %arg1, %c0_i32 : i32
    %1 = arith.extui %0 : i1 to i32
    %c0_i32_0 = arith.constant 0 : i32
    %2 = arith.cmpi ne, %1, %c0_i32_0 : i32
    scf.if %2 {
      %c0_28 = arith.constant 0 : index
      %c0_29 = arith.constant 0 : index
      %65 = vector.load %arg2[%c0_28, %c0_29] : memref<256x128xf32, #tpu.memory_space<vmem>>, vector<256x128xf32>
      %c0_30 = arith.constant 0 : index
      %c0_31 = arith.constant 0 : index
      %66 = vector.load %arg9[%c0_30, %c0_31] : memref<256x128xf32, #tpu.memory_space<vmem>>, vector<256x128xf32>
      tpu.vector_store %arg9[%c0_30, %c0_31], %65 {strides = array<i32>} : memref<256x128xf32, #tpu.memory_space<vmem>>, vector<256x128xf32>,
    } else {
    }
    %c0 = arith.constant 0 : index
    %c0_1 = arith.constant 0 : index
    %3 = vector.load %arg9[%c0, %c0_1] : memref<256x128xf32, #tpu.memory_space<vmem>>, vector<256x128xf32>
    %4 = arith.index_cast %arg1 : i32 to index
    %c0_2 = arith.constant 0 : index
    %c0_3 = arith.constant 0 : index
    %5 = vector.load %arg3[%4, %c0_2, %c0_3] : memref<3x1x128xf32, #tpu.memory_space<vmem>>, vector<1x1x128xf32>
    %6 = vector.shape_cast %5 : vector<1x1x128xf32> to vector<1x128xf32>
    %7 = arith.index_cast %arg1 : i32 to index
    %c0_4 = arith.constant 0 : index
    %c0_5 = arith.constant 0 : index
    %8 = vector.load %arg4[%7, %c0_4, %c0_5] : memref<3x1x128xf32, #tpu.memory_space<vmem>>, vector<1x1x128xf32>
    %9 = vector.shape_cast %8 : vector<1x1x128xf32> to vector<1x128xf32>
    %10 = arith.index_cast %arg1 : i32 to index
    %c0_6 = arith.constant 0 : index
    %c0_7 = arith.constant 0 : index
    %11 = vector.load %arg5[%10, %c0_6, %c0_7] : memref<3x1x256xf32, #tpu.memory_space<vmem>>, vector<1x1x256xf32>
    %12 = vector.shape_cast %11 : vector<1x1x256xf32> to vector<1x256xf32>
    %13 = arith.index_cast %arg1 : i32 to index
    %c0_8 = arith.constant 0 : index
    %c0_9 = arith.constant 0 : index
    %14 = vector.load %arg6[%13, %c0_8, %c0_9] : memref<3x1x128xf32, #tpu.memory_space<vmem>>, vector<1x1x128xf32>
    %15 = vector.shape_cast %14 : vector<1x1x128xf32> to vector<1x128xf32>
    %cst = arith.constant dense<0.000000e+00> : vector<256xf32>
    %16 = vector.multi_reduction <add>, %3, %cst [1] : vector<256x128xf32> to vector<256xf32>
    %17 = vector.shape_cast %16 : vector<256xf32> to vector<256x1xf32>
    %cst_10 = arith.constant 1.280000e+02 : f32
    %18 = vector.broadcast %cst_10 : f32 to vector<256x1xf32>
    %19 = arith.divf %17, %18 : vector<256x1xf32>
    %20 = vector.broadcast %19 : vector<256x1xf32> to vector<256x128xf32>
    %21 = arith.subf %3, %20 : vector<256x128xf32>
    %22 = arith.mulf %21, %21 : vector<256x128xf32>
    %cst_11 = arith.constant dense<0.000000e+00> : vector<256xf32>
    %23 = vector.multi_reduction <add>, %22, %cst_11 [1] : vector<256x128xf32> to vector<256xf32>
    %24 = vector.shape_cast %23 : vector<256xf32> to vector<256x1xf32>
    %cst_12 = arith.constant 1.280000e+02 : f32
    %25 = vector.broadcast %cst_12 : f32 to vector<256x1xf32>
    %26 = arith.divf %24, %25 : vector<256x1xf32>
    %27 = vector.broadcast %19 : vector<256x1xf32> to vector<256x128xf32>
    %28 = arith.subf %3, %27 : vector<256x128xf32>
    %cst_13 = arith.constant 9.99999974E-6 : f32
    %29 = vector.broadcast %cst_13 : f32 to vector<256x1xf32>
    %30 = arith.addf %26, %29 : vector<256x1xf32>
    %31 = math.rsqrt %30 : vector<256x1xf32>
    %32 = vector.broadcast %31 : vector<256x1xf32> to vector<256x128xf32>
    %33 = arith.mulf %28, %32 : vector<256x128xf32>
    %34 = vector.broadcast %6 : vector<1x128xf32> to vector<256x128xf32>
    %35 = arith.mulf %33, %34 : vector<256x128xf32>
    %36 = vector.broadcast %9 : vector<1x128xf32> to vector<256x128xf32>
    %37 = arith.addf %35, %36 : vector<256x128xf32>
    %38 = arith.truncf %37 : vector<256x128xf32> to vector<256x128xbf16>
    %c0_14 = arith.constant 0 : index
    %c0_15 = arith.constant 0 : index
    %c0_16 = arith.constant 0 : index
    %39 = vector.load %arg7[%c0_14, %c0_15, %c0_16] : memref<1x128x256xbf16, #tpu.memory_space<vmem>>, vector<1x128x256xbf16>
    %40 = vector.shape_cast %39 : vector<1x128x256xbf16> to vector<128x256xbf16>
    %cst_17 = arith.constant dense<0.000000e+00> : vector<256x256xf32>
    %41 = tpu.matmul %38, %40, %cst_17 {dimension_numbers = #tpu.dot_dimension_numbers<[1], [0], [0], [1], [0, 0, 1, 1], [], []>} : vector<256x128xbf16>, vector<128x256xbf16>, vector<256x256xf32> -> vector<256x256xf32>
    %42 = vector.broadcast %12 : vector<1x256xf32> to vector<256x256xf32>
    %43 = arith.addf %41, %42 : vector<256x256xf32>
    %44 = arith.mulf %43, %43 : vector<256x256xf32>
    %45 = arith.mulf %43, %44 : vector<256x256xf32>
    %cst_18 = arith.constant 4.471500e-02 : f32
    %46 = vector.broadcast %cst_18 : f32 to vector<256x256xf32>
    %47 = arith.mulf %46, %45 : vector<256x256xf32>
    %48 = arith.addf %43, %47 : vector<256x256xf32>
    %cst_19 = arith.constant 0.797884583 : f32
    %49 = vector.broadcast %cst_19 : f32 to vector<256x256xf32>
    %50 = arith.mulf %49, %48 : vector<256x256xf32>
    %51 = math.tanh %50 : vector<256x256xf32>
    %cst_20 = arith.constant 1.000000e+00 : f32
    %52 = vector.broadcast %cst_20 : f32 to vector<256x256xf32>
    %53 = arith.addf %52, %51 : vector<256x256xf32>
    %cst_21 = arith.constant 5.000000e-01 : f32
    %54 = vector.broadcast %cst_21 : f32 to vector<256x256xf32>
    %55 = arith.mulf %54, %53 : vector<256x256xf32>
    %56 = arith.mulf %43, %55 : vector<256x256xf32>
    %57 = arith.truncf %56 : vector<256x256xf32> to vector<256x256xbf16>
    %c0_22 = arith.constant 0 : index
    %c0_23 = arith.constant 0 : index
    %c0_24 = arith.constant 0 : index
    %58 = vector.load %arg8[%c0_22, %c0_23, %c0_24] : memref<1x256x128xbf16, #tpu.memory_space<vmem>>, vector<1x256x128xbf16>
    %59 = vector.shape_cast %58 : vector<1x256x128xbf16> to vector<256x128xbf16>
    %cst_25 = arith.constant dense<0.000000e+00> : vector<256x128xf32>
    %60 = tpu.matmul %57, %59, %cst_25 {dimension_numbers = #tpu.dot_dimension_numbers<[1], [0], [0], [1], [0, 0, 1, 1], [], []>} : vector<256x256xbf16>, vector<256x128xbf16>, vector<256x128xf32> -> vector<256x128xf32>
    %61 = vector.broadcast %15 : vector<1x128xf32> to vector<256x128xf32>
    %62 = arith.addf %60, %61 : vector<256x128xf32>
    %63 = arith.addf %3, %62 : vector<256x128xf32>
    %c0_26 = arith.constant 0 : index
    %c0_27 = arith.constant 0 : index
    %64 = vector.load %arg9[%c0_26, %c0_27] : memref<256x128xf32, #tpu.memory_space<vmem>>, vector<256x128xf32>
    tpu.vector_store %arg9[%c0_26, %c0_27], %63 {strides = array<i32>} : memref<256x128xf32, #tpu.memory_space<vmem>>, vector<256x128xf32>,
    return
  }
  func.func @transform_0(%arg0: i32, %arg1: i32) -> (i32, i32) {
    %c0_i32 = arith.constant 0 : i32
    %c0_i32_0 = arith.constant 0 : i32
    return %arg0, %c0_i32 : i32, i32
  }
  func.func @transform_1(%arg0: i32, %arg1: i32) -> (i32, i32, i32) {
    %c0_i32 = arith.constant 0 : i32
    %c0_i32_0 = arith.constant 0 : i32
    %c0_i32_1 = arith.constant 0 : i32
    %c0_i32_2 = arith.constant 0 : i32
    return %c0_i32, %c0_i32_0, %c0_i32_1 : i32, i32, i32
  }
  func.func @transform_2(%arg0: i32, %arg1: i32) -> (i32, i32, i32) {
    %c0_i32 = arith.constant 0 : i32
    %c0_i32_0 = arith.constant 0 : i32
    %c0_i32_1 = arith.constant 0 : i32
    %c0_i32_2 = arith.constant 0 : i32
    return %c0_i32, %c0_i32_0, %c0_i32_1 : i32, i32, i32
  }
  func.func @transform_3(%arg0: i32, %arg1: i32) -> (i32, i32, i32) {
    %c0_i32 = arith.constant 0 : i32
    %c0_i32_0 = arith.constant 0 : i32
    %c0_i32_1 = arith.constant 0 : i32
    %c0_i32_2 = arith.constant 0 : i32
    return %c0_i32, %c0_i32_0, %c0_i32_1 : i32, i32, i32
  }
  func.func @transform_4(%arg0: i32, %arg1: i32) -> (i32, i32, i32) {
    %c0_i32 = arith.constant 0 : i32
    %c0_i32_0 = arith.constant 0 : i32
    %c0_i32_1 = arith.constant 0 : i32
    %c0_i32_2 = arith.constant 0 : i32
    return %c0_i32, %c0_i32_0, %c0_i32_1 : i32, i32, i32
  }
  func.func @transform_5(%arg0: i32, %arg1: i32) -> (i32, i32, i32) {
    %c0_i32 = arith.constant 0 : i32
    %c0_i32_0 = arith.constant 0 : i32
    %c0_i32_1 = arith.constant 0 : i32
    return %arg1, %c0_i32, %c0_i32_0 : i32, i32, i32
  }
  func.func @transform_6(%arg0: i32, %arg1: i32) -> (i32, i32, i32) {
    %c0_i32 = arith.constant 0 : i32
    %c0_i32_0 = arith.constant 0 : i32
    %c0_i32_1 = arith.constant 0 : i32
    return %arg1, %c0_i32, %c0_i32_0 : i32, i32, i32
  }
  func.func @transform_7(%arg0: i32, %arg1: i32) -> (i32, i32) {
    %c0_i32 = arith.constant 0 : i32
    %c0_i32_0 = arith.constant 0 : i32
    return %arg0, %c0_i32 : i32, i32
  }
}

</mosaic_0001>

<bundles_post_ra>
// kernel: tpu_custom_call.1
= control target key start
LH: loop header
LB: loop body
LE: loop exit
PB: predicated region body
PF: predicated region fallthrough
CT: control target
= control target key end

     0   :  { %s4816_s0 = inlined_call_operand.hbm [shape: f32[512,128], index: 0, kind: input, shape index: {}]   ;;  %s4817_s1 = inlined_call_operand.hbm [shape: f32[3,1,128], index: 1, kind: input, shape index: {}]   ;;  %s4818_s2 = inlined_call_operand.vmem [shape: f32[3,1,128], index: 2, kind: input, shape index: {}]   ;;  %s4819_s3 = inlined_call_operand.hbm [shape: f32[3,1,256], index: 3, kind: input, shape index: {}]   ;;  %s4820_s4 = inlined_call_operand.vmem [shape: f32[3,1,128], index: 4, kind: input, shape index: {}]   ;;  %s4821_s5 = inlined_call_operand.hbm [shape: bf16[3,128,256], index: 5, kind: input, shape index: {}]   ;;  %s4822_s6 = inlined_call_operand.hbm [shape: bf16[3,256,128], index: 6, kind: input, shape index: {}]   ;;  %s4823_s7 = inlined_call_operand.hbm [shape: f32[512,128], index: 7, kind: output, shape index: {}]  }
   0x1   :  { %4840 = sst [smem:[#allocation23_spill]] %s4817_s1 }
   0x2   :  { %4841 = sst [smem:[#allocation24_spill]] %s4818_s2 }
   0x3   :  { %4842 = sst [smem:[#allocation25_spill]] %s4819_s3 }
   0x4   :  { %4843 = sst [smem:[#allocation26_spill]] %s4820_s4 }
   0x5   :  { %4844 = sst [smem:[#allocation27_spill]] %s4821_s5 }
   0x6   :  { %4845 = sst [smem:[#allocation28_spill]] %s4822_s6 }
   0x7   :  { %4846 = sst [smem:[#allocation29_spill]] %s4823_s7 }
   0x8   :  { %12 = vsyncpa [#allocation3], 0 }
   0x9   :  { %14 = vsyncpa [#allocation3 + $0x1], 0 }
   0xa   :  { %15 = vsyncpa [#allocation6], 0 }
   0xb   :  { %16 = vsyncpa [#allocation9], 0 }
   0xc   :  { %18 = vsyncpa [#allocation9 + $0x1], 0 }
   0xd   :  { %19 = vsyncpa [#allocation4], 0 }
   0xe   :  { %21 = vsyncpa [#allocation4 + $0x1], 0  ;;  %s3315_s24 = smov 0   ;;  %s3317_s25 = smov 0  }
   0xf   :  { %s3319_s26 = smov 0   ;;  %s3321_s27 = smov 0  }
  0x10   :  { %s3323_s28 = smov 0   ;;  %s3325_s29 = smov 0  }
  0x11   :  { %s3327_s30 = smov 0   ;;  %s3329_s8 = smov 0  }
  0x12   :  { %s3331_s9 = smov 0   ;;  %s3333_s10 = smov 0  }
  0x13   :  { %s3335_s11 = smov 0  }
  0x14 LB: > { %4847 = sst [smem:[#allocation16_spill]] %s3228_s27  ;;  %s3369_s12 = sadd.s32 4294967295, %s3256_s11   ;;  %s3256_s11 = sphi %s3335_s11, %s27_s11   ;;  %s3252_s10 = sphi %s3333_s10, %s4899_s10   ;;  %s3248_s9 = sphi %s3331_s9, %s4898_s9   ;;  %s3244_s8 = sphi %s3329_s8, %s4897_s8   ;;  %s3240_s30 = sphi %s3327_s30, %s4896_s30   ;;  %s3236_s29 = sphi %s3325_s29, %s4895_s29   ;;  %s3232_s28 = sphi %s3323_s28, %s4894_s28   ;;  %s3228_s27 = sphi %s3321_s27, %s4893_s27   ;;  %s3224_s26 = sphi %s3319_s26, %s4892_s26   ;;  %s3220_s25 = sphi %s3317_s25, %s4891_s25   ;;  %s3216_s24 = sphi %s3315_s24, %s4890_s24  }
  0x15   : > { %4848 = sst [smem:[#allocation17_spill]] %s3240_s30  ;;  %s2405_s13 = sadd.s32 4294967294, %s3256_s11  }
  0x16   : > { %4849 = sst [smem:[#allocation18_spill]] %s3244_s8  ;;  %p59_p0 = scmp.ne.s32.totalorder %s3232_s28, %s3228_s27 }
  0x17   : > { %p4831_p1 = scmp.eq.s32.totalorder %s3369_s12, 0  ;;  %p169_p2 = scmp.ne.s32.totalorder %s3220_s25, %s3216_s24 }
  0x18   : > { %p225_p5 = scmp.eq.s32.totalorder %s2405_s13, 5  ;;  %p2406_p7 = scmp.ge.s32.totalorder %s3256_s11, 1 }
  0x19   : > { %p3379_p4 = por %p4831_p1, %p59_p0  ;;  %p3385_p6 = por %p169_p2, %p4831_p1 }
  0x1a   : > { %p3390_p8 = por %p225_p5, %p59_p0  ;;  %p232_p9 = scmp.lt.s32.totalorder %s3256_s11, 7 }
  0x1b   : > { %s4851_s15 = scalar_select %p3385_p6, 1, 0 }
  0x1c   : > { %s4853_s16 = scalar_select %p3390_p8, 1, 0 }
  0x1d   : > { %4852 = sst [smem:[#allocation19_spill]] %s4851_s15  ;;  %p3395_p10 = pnand %p2406_p7, %p232_p9 }
  0x1e   : > { %4854 = sst [smem:[#allocation20_spill]] %s4853_s16  ;;  %s3258_s18 = smov [#allocation5]  }
  0x1f   : > { %s244_s19 = sshll.u32 %s3258_s18, 4  ;;  %p2600_p11 = pneg %p3395_p10  ;;  %s245_s19 = int_to_ptr.vmem [resolvable:$true] %s244_s19 }
  0x20   : > { %s36_s21 = sadd.s32 1, %s3248_s9  ;;  %s3003_s22 = scalar_lea.vmem %s245_s19, 48 }
  0x21   : > { %p3403_p12 = pnand %p2600_p11, %p4831_p1  ;;  %p3004_p0 = scmp.ne.s32.totalorder %s245_s19, %s3003_s22 }
  0x22   : > { %s3010_s23 = scalar_lea.vmem %s245_s19, 64  ;;  %p3011_p7 = scmp.lt.s32.totalorder %s245_s19, %s245_s19 }
  0x23   : > { %p4834_p13 = pneg %p3403_p12  ;;  %p3012_p9 = scmp.lt.s32.totalorder %s3010_s23, %s3003_s22 }
  0x25   : > { %p3006_p2 = pnand %p3004_p0, %p4834_p13  ;;  %p3013_p3 = por %p3012_p9, %p3011_p7 }
  0x27   : > { %p3007_p5 = pneg %p3006_p2 }
  0x29   : > { %p3014_p8 = pnand %p3013_p3, %p3007_p5 }
  0x2b   : > { %3017 = shalt.err (!%p3014_p8)
}
  0x2c   : > { %s3259_s24 = smov 16   ;;  %s3260_s13 = smov 1  }
  0x2d   : > { %s4857_s1 = sld [smem:[#allocation23_spill]]  ;;  %p3418_p3 = scmp.ge.s32.totalorder %s36_s21, 3 }
  0x2e   : > { %p4833_p8 = scmp.eq.s32.totalorder %s3256_s11, 0  ;;  %s156_s16 = sadd.s32 1, %s3224_s26 }
  0x2f   : > { %p163_p11 = scmp.ne.s32.totalorder %s3224_s26, %s3220_s25  ;;  %s4901_s21 = smov (%p3418_p3, %s36_s21), 0 }
  0x30   : > { %4859 = sst [smem:[#allocation21_spill]] %s4901_s21  ;;  %p4832_p2 = scmp.lt.s32.totalorder %s3256_s11, 6 }
  0x31   : > { %p3432_p0 = por %p163_p11, %p4833_p8  ;;  %s4861_s5 = sld [smem:[#allocation27_spill]] }
  0x32   : > { %s4863_s6 = sld [smem:[#allocation28_spill]]  ;;  %s3261_s27 = smov [#allocation8]  }
  0x33   : > { %2603 = dma.hbm_to_vmem [thread:$0]  (!%p3403_p12), %s4857_s1, 48, %s245_s19, [#allocation6], %s3259_s24, %s3259_s24, %s3260_s13  }
  0x34   : > { %s153_s19 = ssub.s32 %s3248_s9, %s4901_s21  ;;  %s298_s24 = sand.u32 1, %s3256_s11  }
  0x35   : > { %p154_p5 = scmp.eq.s32.totalorder %s153_s19, 0  ;;  %s300_s13 = sand.u32 1, %s3224_s26  }
  0x36   : > { %s2413_s22 = sshll.u32 %s300_s13, 7  ;;  %s2469_s1 = sshll.u32 %s3248_s9, 11 }
  0x37   : > { %s3442_s18 = scalar_select %p154_p5, %s3224_s26, %s156_s16  }
  0x38   : > { %s3448_s4 = scalar_lea.hbm %s4861_s5, %s2469_s1  ;;  %s302_s2 = scalar_lea.vmem [#allocation8], %s2413_s22 }
  0x39   : > { %s309_s30 = sshll.u32 %s302_s2, 4  ;;  %p3454_p7 = pnand %p4832_p2, %p3432_p0  ;;  %s310_s30 = int_to_ptr.vmem [resolvable:$true] %s309_s30 }
  0x3a   : > { %s3461_s16 = scalar_lea.hbm %s4863_s6, %s2469_s1  ;;  %s323_s13 = scalar_lea.vmem [#allocation10], %s2413_s22 }
  0x3b   : > { %s330_s7 = sshll.u32 %s323_s13, 4  ;;  %s3463_s8 = scalar_lea.sflag [#allocation9], %s298_s24  ;;  %s3477_s7 = int_to_ptr.vmem [resolvable:$true] %s330_s7 }
  0x3c   : > { %p4835_p9 = pneg %p3454_p7  ;;  %s3031_s2 = scalar_lea.vmem %s310_s30, 2048 }
  0x3d   : > { %p3032_p11 = scmp.ne.s32.totalorder %s310_s30, %s3031_s2  ;;  %s3036_s5 = sshll.u32 %s3261_s27, 4  ;;  %s3037_s5 = int_to_ptr.vmem [resolvable:$false] %s3036_s5 }
  0x3e   : > { %s3038_s21 = scalar_lea.vmem %s3037_s5, 4096  ;;  %p3039_p1 = scmp.lt.s32.totalorder %s310_s30, %s3037_s5 }
  0x3f   : > { %p3034_p0 = pnand %p3032_p11, %p4835_p9  ;;  %p3040_p2 = scmp.lt.s32.totalorder %s3038_s21, %s3031_s2 }
  0x41   : > { %p3035_p5 = pneg %p3034_p0  ;;  %p3041_p8 = por %p3040_p2, %p3039_p1 }
  0x43   : > { %p3042_p13 = pnand %p3041_p8, %p3035_p5 }
  0x45   : > { %3045 = shalt.err (!%p3042_p13)
}
  0x46   : > { %s4836_s1 = smov 128   ;;  %s4837_s24 = smov 8  }
  0x47   : > { %2613 = dma.hbm_to_vmem [thread:$0]  (!%p3454_p7), %s3448_s4, 2048, %s310_s30, %s3463_s8, %s4836_s1, %s4836_s1, %s4837_s24  }
  0x48   : > { %s3264_s22 = smov [#allocation7]   ;;  %p4864_p13 = pneg %p3403_p12 }
  0x49   : > { %s260_s19 = sshll.u32 %s3264_s22, 4  ;;  %s261_s19 = int_to_ptr.vmem [resolvable:$true] %s260_s19 }
  0x4a   : > { %s3057_s5 = scalar_lea.vmem %s261_s19, 96  ;;  %p3065_p11 = scmp.lt.s32.totalorder %s261_s19, %s261_s19 }
  0x4b   : > { %p3058_p1 = scmp.ne.s32.totalorder %s261_s19, %s3057_s5  ;;  %p3066_p0 = scmp.lt.s32.totalorder %s3057_s5, %s3057_s5 }
  0x4d   : > { %p3060_p8 = pnand %p3058_p1, %p4864_p13  ;;  %p3067_p5 = por %p3066_p0, %p3065_p11 }
  0x4f   : > { %p3061_p2 = pneg %p3060_p8 }
  0x51   : > { %p3068_p9 = pnand %p3067_p5, %p3061_p2 }
  0x53   : > { %3071 = shalt.err (!%p3068_p9)
}
  0x54   : > { %s3265_s13 = smov 32   ;;  %s3266_s4 = smov 2  }
  0x55   : > { %s4865_s3 = sld [smem:[#allocation25_spill]]  ;;  %s39_s27 = sadd.s32 1, %s3252_s10 }
  0x56   : > { %s46_s21 = sadd.s32 1, %s3236_s29  ;;  %s4903_s27 = smov (!%p3418_p3, %s39_s27), %s3252_s10 }
  0x57   : > { %p53_p9 = scmp.ne.s32.totalorder %s3236_s29, %s3232_s28  ;;  %s277_s22 = sand.u32 1, %s3236_s29  }
  0x58   : > { %p41_p1 = scmp.ge.s32.totalorder %s4903_s27, 2  ;;  %p4866_p13 = scmp.eq.s32.totalorder %s3256_s11, 0 }
  0x59   : > { %p4867_p2 = scmp.eq.s32.totalorder %s3369_s12, 5  ;;  %s2410_s20 = sshll.u32 %s277_s22, 8 }
  0x5a   : > { %p55_p8 = por %p4866_p13, %p53_p9  ;;  %s4905_s27 = smov (%p41_p1, %s4903_s27), 0 }
  0x5b   : > { %2606 = dma.hbm_to_vmem [thread:$0]  (!%p3403_p12), %s4865_s3, 96, %s261_s19, [#allocation6], %s3265_s13, %s3265_s13, %s3266_s4  }
  0x5c   : > { %p3499_p11 = por %p4867_p2, %p53_p9  ;;  %4869 = sst [smem:[#allocation22_spill]] %s4905_s27 }
  0x5d   : > { %s2468_s19 = sshll.u32 %s3252_s10, 12  ;;  %s43_s13 = ssub.s32 %s3252_s10, %s4905_s27 }
  0x5e   : > { %s4868_s5 = scalar_select %p3499_p11, 1, 0 }
  0x5f   : > { %p44_p12 = scmp.eq.s32.totalorder %s43_s13, 0  ;;  %s287_s30 = scalar_lea.hbm %s4816_s0, %s2468_s19 }
  0x60   : > { %s281_s2 = scalar_lea.vmem [#allocation2], %s2410_s20  ;;  %p4870_p3 = scmp.lt.s32.totalorder %s3256_s11, 6 }
  0x61   : > { %s288_s1 = sshll.u32 %s281_s2, 4  ;;  %s278_s6 = scalar_lea.sflag [#allocation3], %s277_s22  ;;  %s289_s1 = int_to_ptr.vmem [resolvable:$true] %s288_s1 }
  0x62   : > { %p3513_p0 = pnand %p4870_p3, %p55_p8  ;;  %s3085_s27 = scalar_lea.vmem %s289_s1, 4096 }
  0x63   : > { %s3518_s3 = scalar_select %p44_p12, %s3236_s29, %s46_s21  }
  0x64   : > { %p3074_p5 = pneg %p3513_p0  ;;  %p3086_p9 = scmp.ne.s32.totalorder %s289_s1, %s3085_s27 }
  0x65   : > { %s3267_s13 = smov [#allocation2]  }
  0x66   : > { %p3088_p1 = pnand %p3086_p9, %p3074_p5  ;;  %s3090_s19 = sshll.u32 %s3267_s13, 4  ;;  %s3091_s19 = int_to_ptr.vmem [resolvable:$false] %s3090_s19 }
  0x67   : > { %s3092_s20 = scalar_lea.vmem %s3091_s19, 8192  ;;  %p3093_p2 = scmp.lt.s32.totalorder %s289_s1, %s3091_s19 }
  0x68   : > { %p3089_p13 = pneg %p3088_p1  ;;  %p3094_p8 = scmp.lt.s32.totalorder %s3092_s20, %s3085_s27 }
  0x6a   : > { %p3095_p3 = por %p3094_p8, %p3093_p2 }
  0x6c   : > { %p3096_p11 = pnand %p3095_p3, %p3089_p13 }
  0x6e   : > { %3099 = shalt.err (!%p3096_p11)
}
  0x6f   : > { %s4872_s21 = smov 8   ;;  %s4873_s23 = smov 128  }
  0x70   : > { %2610 = dma.hbm_to_vmem [thread:$0]  (!%p3513_p0), %s287_s30, 4096, %s289_s1, %s278_s6, %s4873_s23, %s4873_s23, %s4872_s21  }
  0x71   : > { %s3113_s22 = scalar_lea.vmem %s3477_s7, 2048  ;;  %p4874_p5 = pneg %p3454_p7 }
  0x72   : > { %p3114_p12 = scmp.ne.s32.totalorder %s3477_s7, %s3113_s22  ;;  %s3268_s27 = smov [#allocation10]  }
  0x73   : > { %s3118_s4 = sshll.u32 %s3268_s27, 4  ;;  %s3119_s4 = int_to_ptr.vmem [resolvable:$false] %s3118_s4 }
  0x74   : > { %p3116_p9 = pnand %p3114_p12, %p4874_p5  ;;  %s3120_s2 = scalar_lea.vmem %s3119_s4, 4096 }
  0x75   : > { %p3121_p11 = scmp.lt.s32.totalorder %s3477_s7, %s3119_s4  ;;  %p3122_p13 = scmp.lt.s32.totalorder %s3120_s2, %s3113_s22 }
  0x76   : > { %p3117_p1 = pneg %p3116_p9 }
  0x77   : > { %p3123_p2 = por %p3122_p13, %p3121_p11 }
  0x79   : > { %p3124_p8 = pnand %p3123_p2, %p3117_p1 }
  0x7b   : > { %3127 = shalt.err (!%p3124_p8)
}
  0x7c   : > { %s3269_s24 = smov 64   ;;  %s3270_s6 = smov 4  }
  0x7d   : > { %2616 = dma.hbm_to_vmem [thread:$0]  (!%p3454_p7), %s3461_s16, 2048, %s3477_s7, %s3463_s8, %s3269_s24, %s3269_s24, %s3270_s6  }
  0x7e   : > { %342 = sbr.rel (%p3395_p10) target bundleno = 1136 (0x470), region = 48  ;;  %s3541_s1 = sand.u32 (!%p3395_p10), 1, %s3232_s28  }
  0x7f   : > { %s2420_s30 = sshll.u32 (!%p3395_p10), %s3541_s1, 8  ;;  %s345_s13 = scalar_lea.sflag (!%p3395_p10), [#allocation3], %s3541_s1 }
  0x80   : > { %s3545_s19 = scalar_lea.vmem (!%p3395_p10), [#allocation2], %s2420_s30 }
  0x83   : > { %3199 = dma.done.wait (%p3379_p4), %s345_s13, 4096  }
  0x84   : > { %3201 = vsyncadd (%p3379_p4), %s345_s13, 4294963200  ;;  %p4875_p7 = scmp.eq.s32.totalorder %s3369_s12, 0 }
  0x86   : > { %3203 = dma.done.wait (%p4875_p7), [#allocation6], 144   ;;  %p4876_p10 = pmov %p4875_p7 }
  0x87   : > { %s361_s17 = sand.u32 1, %s3369_s12   ;;  %s363_s16 = sand.u32 1, %s3220_s25  }
  0x88   : > { %3205 = vsyncadd (%p4876_p10), [#allocation6], 4294967152  ;;  %s2423_s7 = sshll.u32 %s363_s16, 7  ;;  %s362_s8 = scalar_lea.sflag [#allocation9], %s361_s17 }
  0x89   : > { %s3557_s20 = scalar_lea.vmem [#allocation8], %s2423_s7 }
  0x8a   : > { %3207 = dma.done.wait (%p3385_p6), %s362_s8, 4096  }
  0x8b   : > { %3209 = vsyncadd (%p3385_p6), %s362_s8, 4294963200  ;;  %s3563_s14 = scalar_lea.vmem [#allocation10], %s2423_s7  ;;  %s3565_s21 = scalar_lea.vmem [#allocation11], %s2420_s30 }
  0x8c   : > { %s4878_s23 = sld [smem:[#allocation17_spill]] }
  0x92   : > { %p2426_p4 = scmp.ne.s32.totalorder %s4878_s23, 0 }
  0x94   : > { %421 = sbr.rel (%p2426_p4) target bundleno = 170 (0xaa), region = 72 }
  0x99   : > { %v422_v0 = vld [vmem:[%s3545_s19] sm:$0xff]  ;;  %v423_v1 = vld [vmem:[%s3545_s19 + $0x8] sm:$0xff]  ;;  %v424_v2 = vld [vmem:[%s3545_s19 + $0x10] sm:$0xff] }
  0x9a   : > { %454 = vst [vmem:[%s3565_s21] sm:$0xff] %v422_v0  ;;  %455 = vst [vmem:[%s3565_s21 + $0x8] sm:$0xff] %v423_v1  ;;  %v425_v3 = vld [vmem:[%s3545_s19 + $0x18] sm:$0xff]  ;;  %v426_v4 = vld [vmem:[%s3545_s19 + $0x20] sm:$0xff] }
  0x9b   : > { %456 = vst [vmem:[%s3565_s21 + $0x10] sm:$0xff] %v424_v2  ;;  %v427_v5 = vld [vmem:[%s3545_s19 + $0x28] sm:$0xff]  ;;  %457 = vst [vmem:[%s3565_s21 + $0x18] sm:$0xff] %v425_v3  ;;  %v428_v6 = vld [vmem:[%s3545_s19 + $0x30] sm:$0xff] }
  0x9c   : > { %458 = vst [vmem:[%s3565_s21 + $0x20] sm:$0xff] %v426_v4  ;;  %459 = vst [vmem:[%s3565_s21 + $0x28] sm:$0xff] %v427_v5  ;;  %v429_v7 = vld [vmem:[%s3545_s19 + $0x38] sm:$0xff]  ;;  %v430_v8 = vld [vmem:[%s3545_s19 + $0x40] sm:$0xff] }
  0x9d   : > { %460 = vst [vmem:[%s3565_s21 + $0x30] sm:$0xff] %v428_v6  ;;  %461 = vst [vmem:[%s3565_s21 + $0x38] sm:$0xff] %v429_v7  ;;  %v431_v9 = vld [vmem:[%s3545_s19 + $0x48] sm:$0xff]  ;;  %v432_v10 = vld [vmem:[%s3545_s19 + $0x50] sm:$0xff] }
  0x9e   : > { %462 = vst [vmem:[%s3565_s21 + $0x40] sm:$0xff] %v430_v8  ;;  %v433_v11 = vld [vmem:[%s3545_s19 + $0x58] sm:$0xff]  ;;  %463 = vst [vmem:[%s3565_s21 + $0x48] sm:$0xff] %v431_v9  ;;  %v434_v12 = vld [vmem:[%s3545_s19 + $0x60] sm:$0xff] }
  0x9f   : > { %464 = vst [vmem:[%s3565_s21 + $0x50] sm:$0xff] %v432_v10  ;;  %465 = vst [vmem:[%s3565_s21 + $0x58] sm:$0xff] %v433_v11  ;;  %v435_v13 = vld [vmem:[%s3545_s19 + $0x68] sm:$0xff]  ;;  %v436_v14 = vld [vmem:[%s3545_s19 + $0x70] sm:$0xff] }
  0xa0   : > { %466 = vst [vmem:[%s3565_s21 + $0x60] sm:$0xff] %v434_v12  ;;  %467 = vst [vmem:[%s3565_s21 + $0x68] sm:$0xff] %v435_v13  ;;  %v437_v15 = vld [vmem:[%s3545_s19 + $0x78] sm:$0xff]  ;;  %v438_v16 = vld [vmem:[%s3545_s19 + $0x80] sm:$0xff] }
  0xa1   : > { %468 = vst [vmem:[%s3565_s21 + $0x70] sm:$0xff] %v436_v14  ;;  %v439_v17 = vld [vmem:[%s3545_s19 + $0x88] sm:$0xff]  ;;  %469 = vst [vmem:[%s3565_s21 + $0x78] sm:$0xff] %v437_v15  ;;  %v440_v18 = vld [vmem:[%s3545_s19 + $0x90] sm:$0xff] }
  0xa2   : > { %470 = vst [vmem:[%s3565_s21 + $0x80] sm:$0xff] %v438_v16  ;;  %471 = vst [vmem:[%s3565_s21 + $0x88] sm:$0xff] %v439_v17  ;;  %v441_v19 = vld [vmem:[%s3545_s19 + $0x98] sm:$0xff]  ;;  %v442_v20 = vld [vmem:[%s3545_s19 + $0xa0] sm:$0xff] }
  0xa3   : > { %472 = vst [vmem:[%s3565_s21 + $0x90] sm:$0xff] %v440_v18  ;;  %473 = vst [vmem:[%s3565_s21 + $0x98] sm:$0xff] %v441_v19  ;;  %v443_v21 = vld [vmem:[%s3545_s19 + $0xa8] sm:$0xff]  ;;  %v444_v22 = vld [vmem:[%s3545_s19 + $0xb0] sm:$0xff] }
  0xa4   : > { %474 = vst [vmem:[%s3565_s21 + $0xa0] sm:$0xff] %v442_v20  ;;  %v445_v23 = vld [vmem:[%s3545_s19 + $0xb8] sm:$0xff]  ;;  %475 = vst [vmem:[%s3565_s21 + $0xa8] sm:$0xff] %v443_v21  ;;  %v446_v24 = vld [vmem:[%s3545_s19 + $0xc0] sm:$0xff] }
  0xa5   : > { %476 = vst [vmem:[%s3565_s21 + $0xb0] sm:$0xff] %v444_v22  ;;  %477 = vst [vmem:[%s3565_s21 + $0xb8] sm:$0xff] %v445_v23  ;;  %v447_v25 = vld [vmem:[%s3545_s19 + $0xc8] sm:$0xff]  ;;  %v448_v26 = vld [vmem:[%s3545_s19 + $0xd0] sm:$0xff] }
  0xa6   : > { %478 = vst [vmem:[%s3565_s21 + $0xc0] sm:$0xff] %v446_v24  ;;  %479 = vst [vmem:[%s3565_s21 + $0xc8] sm:$0xff] %v447_v25  ;;  %v449_v27 = vld [vmem:[%s3545_s19 + $0xd8] sm:$0xff]  ;;  %v450_v28 = vld [vmem:[%s3545_s19 + $0xe0] sm:$0xff] }
  0xa7   : > { %480 = vst [vmem:[%s3565_s21 + $0xd0] sm:$0xff] %v448_v26  ;;  %v451_v29 = vld [vmem:[%s3545_s19 + $0xe8] sm:$0xff]  ;;  %481 = vst [vmem:[%s3565_s21 + $0xd8] sm:$0xff] %v449_v27  ;;  %v452_v30 = vld [vmem:[%s3545_s19 + $0xf0] sm:$0xff] }
  0xa8   : > { %482 = vst [vmem:[%s3565_s21 + $0xe0] sm:$0xff] %v450_v28  ;;  %483 = vst [vmem:[%s3565_s21 + $0xe8] sm:$0xff] %v451_v29  ;;  %v453_v31 = vld [vmem:[%s3545_s19 + $0xf8] sm:$0xff] }
  0xa9   : > { %484 = vst [vmem:[%s3565_s21 + $0xf0] sm:$0xff] %v452_v30  ;;  %485 = vst [vmem:[%s3565_s21 + $0xf8] sm:$0xff] %v453_v31 }
  0xaa PF: > { %v486_v32 = vld [vmem:[%s3565_s21] sm:$0xff]  ;;  %v488_v33 = vld [vmem:[%s3565_s21 + $0x10] sm:$0xff]  ;;  %v487_v34 = vld [vmem:[%s3565_s21 + $0x8] sm:$0xff]  ;;  %s4879_s12 = sld [smem:[#allocation17_spill]]  ;;  %s2253_s8 = sshll.u32 %s3565_s21, 4  ;;  %s4752_s8 = int_to_ptr.vmem [resolvable:$true] %s2253_s8 }
  0xab   : > { %527 = vadd.xlane.f32.xlu0 %v486_v32  ;;  %531 = vadd.xlane.f32.xlu1 %v488_v33  ;;  %v489_v35 = vld [vmem:[%s3565_s21 + $0x18] sm:$0xff]  ;;  %v490_v36 = vld [vmem:[%s3565_s21 + $0x20] sm:$0xff]  ;;  %v3638_v37 = vld [vmem:[%s3565_s21 + $0x28] sm:$0xff]  ;;  %s4880_s2 = sld [smem:[#allocation24_spill]]  ;;  %s3128_s27 = scalar_lea.vmem %s4752_s8, 4096 }
  0xac   : > { %v3641_v38 = vld [vmem:[%s3565_s21 + $0x30] sm:$0xff]  ;;  %v3644_v39 = vld [vmem:[%s3565_s21 + $0x38] sm:$0xff]  ;;  %v3648_v40 = vld [vmem:[%s3565_s21 + $0x40] sm:$0xff]  ;;  %s4881_s15 = sld [smem:[#allocation26_spill]]  ;;  %p3129_p6 = scmp.ne.s32.totalorder %s4752_s8, %s3128_s27 }
  0xad   : > { %v3651_v41 = vld [vmem:[%s3565_s21 + $0x48] sm:$0xff]  ;;  %v3656_v42 = vld [vmem:[%s3565_s21 + $0x50] sm:$0xff]  ;;  %v3661_v43 = vld [vmem:[%s3565_s21 + $0x58] sm:$0xff]  ;;  %s4882_s16 = sld [smem:[#allocation18_spill]]  ;;  %p4884_p0 = scmp.ne.s32.totalorder %s4868_s5, 0 }
  0xae   : > { %v3664_v44 = vld [vmem:[%s3565_s21 + $0x60] sm:$0xff]  ;;  %v3667_v45 = vld [vmem:[%s3565_s21 + $0x68] sm:$0xff]  ;;  %v3674_v46 = vld [vmem:[%s3565_s21 + $0x70] sm:$0xff]  ;;  %s4883_s23 = sld [smem:[#allocation29_spill]]  ;;  %s3272_s4 = smov [#allocation11]  }
  0xaf   : > { %529 = vadd.xlane.f32.xlu0 %v487_v34  ;;  %533 = vadd.xlane.f32.xlu1 %v489_v35  ;;  %v3677_v47 = vld [vmem:[%s3565_s21 + $0x78] sm:$0xff]  ;;  %v3682_v48 = vld [vmem:[%s3565_s21 + $0x80] sm:$0xff]  ;;  %v3685_v49 = vld [vmem:[%s3565_s21 + $0x88] sm:$0xff]  ;;  %p3130_p3 = pnand %p3129_p6, %p4884_p0 }
  0xb0   : > { %v3690_v50 = vld [vmem:[%s3565_s21 + $0x90] sm:$0xff]  ;;  %v3693_v51 = vld [vmem:[%s3565_s21 + $0x98] sm:$0xff]  ;;  %v3708_v2 = vld [vmem:[%s3565_s21 + $0xa0] sm:$0xff]  ;;  %s518_s22 = scalar_lea.vmem [#allocation5], %s4879_s12  ;;  %s2427_s6 = sshll.u32 %s4879_s12, 1 }
  0xb1   : > { %v2728_v52 = vld [vmem:[%s3557_s20 + $0x74] ss:$8 sps:$4 sm:$0xff]   ;;  %v2730_v53 = vld [vmem:[%s3557_s20 + $0x70] ss:$8 sps:$4 sm:$0xff]   ;;  %v3718_v8 = vld [vmem:[%s3565_s21 + $0xa8] sm:$0xff]  ;;  %s520_s24 = scalar_lea.vmem %s4880_s2, %s4879_s12  ;;  %s523_s30 = scalar_lea.vmem [#allocation7], %s2427_s6 }
  0xb2   : > { %1079 = vmatprep.subr.bf16.mxu0 %v2728_v52  ;;  %v3726_v13 = vld [vmem:[%s3565_s21 + $0xb0] sm:$0xff]  ;;  %v2731_v15 = vld [vmem:[%s3557_s20 + $0x64] ss:$8 sps:$4 sm:$0xff]   ;;  %v2733_v16 = vld [vmem:[%s3557_s20 + $0x60] ss:$8 sps:$4 sm:$0xff]   ;;  %s525_s17 = scalar_lea.vmem %s4881_s15, %s4879_s12  ;;  %p3131_p12 = pneg %p3130_p3 }
  0xb3   : > { %535 = vadd.xlane.f32.xlu0 %v490_v36  ;;  %537 = vadd.xlane.f32.xlu1 %v3638_v37  ;;  %v3737_v20 = vld [vmem:[%s3565_s21 + $0xb8] sm:$0xff]  ;;  %v3748_v27 = vld [vmem:[%s3565_s21 + $0xc0] sm:$0xff]  ;;  %s2471_s7 = sshll.u32 %s4882_s16, 12  ;;  %s3132_s2 = sshll.u32 %s3272_s4, 4  ;;  %s3133_s2 = int_to_ptr.vmem [resolvable:$false] %s3132_s2 }
  0xb4   : > { %1080 = vmatpush1.bf16.msra.mxu0 %v2730_v53  ;;  %v2734_v22 = vld [vmem:[%s3557_s20 + $0x54] ss:$8 sps:$4 sm:$0xff]   ;;  %v2736_v23 = vld [vmem:[%s3557_s20 + $0x50] ss:$8 sps:$4 sm:$0xff]   ;;  %v2737_v29 = vld [vmem:[%s3557_s20 + $0x44] ss:$8 sps:$4 sm:$0xff]   ;;  %s4750_s12 = scalar_lea.hbm %s4883_s23, %s2471_s7  ;;  %p3135_p5 = scmp.lt.s32.totalorder %s4752_s8, %s3133_s2 }
  0xb5   : > { %1081 = vmatprep.subr.bf16.mxu0 %v2731_v15  ;;  %v2739_v30 = vld [vmem:[%s3557_s20 + $0x40] ss:$8 sps:$4 sm:$0xff]  }
  0xb7   : > { %539 = vadd.xlane.f32.xlu0 %v3641_v38  ;;  %541 = vadd.xlane.f32.xlu1 %v3644_v39 }
  0xb8   : > { %1082 = vmatpush1.bf16.msra.mxu0 %v2733_v16 }
  0xb9   : > { %1083 = vmatprep.subr.bf16.mxu0 %v2734_v22 }
  0xbb   : > { %543 = vadd.xlane.f32.xlu0 %v3648_v40  ;;  %545 = vadd.xlane.f32.xlu1 %v3651_v41 }
  0xbc   : > { %1084 = vmatpush1.bf16.msra.mxu0 %v2736_v23  ;;  %v3271_v23 = vmov 0  }
  0xbd   : > { %1085 = vmatprep.subr.bf16.mxu0 %v2737_v29  ;;  %1111 = vmatprep.mubr.bf16.mxu0 %v3271_v23 }
  0xbf   : > { %547 = vadd.xlane.f32.xlu0 %v3656_v42  ;;  %549 = vadd.xlane.f32.xlu1 %v3661_v43 }
  0xc0   : > { %1086 = vmatpush1.bf16.msra.mxu0 %v2739_v30 }
  0xc3   : > { %551 = vadd.xlane.f32.xlu0 %v3664_v44  ;;  %553 = vadd.xlane.f32.xlu1 %v3667_v45 }
  0xc7   : > { %555 = vadd.xlane.f32.xlu0 %v3674_v46  ;;  %557 = vadd.xlane.f32.xlu1 %v3677_v47 }
  0xcb   : > { %559 = vadd.xlane.f32.xlu0 %v3682_v48  ;;  %561 = vadd.xlane.f32.xlu1 %v3685_v49 }
  0xcf   : > { %563 = vadd.xlane.f32.xlu0 %v3690_v50  ;;  %565 = vadd.xlane.f32.xlu1 %v3693_v51 }
 0x134   : > { %v528_v54 = vpop.xlane.xlu0 %527  ;;  %v532_v55 = vpop.xlane.xlu1 %531 }
 0x135   : > { %v592_v56 = vmul.f32 0.0078125, %v528_v54  ;;  %v594_v58 = vmul.f32 0.0078125, %v532_v55  ;;  %v3770_v54 = vld [vmem:[%s3565_s21 + $0xd0] sm:$0xff]  ;;  %v2743_v55 = vld [vmem:[%s3557_s20 + $0x24] ss:$8 sps:$4 sm:$0xff]  }
 0x137   : > { %v3699_v57 = vsub.f32 %v486_v32, %v592_v56  ;;  %v3705_v0 = vsub.f32 %v488_v33, %v594_v58 }
 0x138   : > { %v530_v59 = vpop.xlane.xlu0 %529  ;;  %v534_v60 = vpop.xlane.xlu1 %533 }
 0x139   : > { %v593_v61 = vmul.f32 0.0078125, %v530_v59  ;;  %v656_v62 = vmul.f32 %v3699_v57, %v3699_v57  ;;  %v595_v1 = vmul.f32 0.0078125, %v534_v60  ;;  %v658_v6 = vmul.f32 %v3705_v0, %v3705_v0  ;;  %v2745_v59 = vld [vmem:[%s3557_s20 + $0x20] ss:$8 sps:$4 sm:$0xff]  }
 0x13b   : > { %v3703_v63 = vsub.f32 %v487_v34, %v593_v61  ;;  %688 = vadd.xlane.f32.xlu0 %v656_v62  ;;  %v3713_v5 = vsub.f32 %v489_v35, %v595_v1  ;;  %v3759_v34 = vld [vmem:[%s3565_s21 + $0xc8] sm:$0xff]  ;;  %v3781_v62 = vld [vmem:[%s3565_s21 + $0xd8] sm:$0xff] }
 0x13c   : > { %v536_v3 = vpop.xlane.xlu0 %535  ;;  %v538_v9 = vpop.xlane.xlu1 %537  ;;  %v2746_v1 = vld [vmem:[%s3557_s20 + $0x14] ss:$8 sps:$4 sm:$0xff]  }
 0x13d   : > { %v657_v4 = vmul.f32 %v3703_v63, %v3703_v63  ;;  %v596_v7 = vmul.f32 0.0078125, %v536_v3  ;;  %v659_v11 = vmul.f32 %v3713_v5, %v3713_v5  ;;  %v597_v12 = vmul.f32 0.0078125, %v538_v9  ;;  %v3792_v9 = vld [vmem:[%s3565_s21 + $0xe0] sm:$0xff] }
 0x13f   : > { %567 = vadd.xlane.f32.xlu0 %v3708_v2  ;;  %690 = vadd.xlane.f32.xlu1 %v657_v4  ;;  %v3721_v10 = vsub.f32 %v490_v36, %v596_v7  ;;  %v3732_v17 = vsub.f32 %v3638_v37, %v597_v12  ;;  %v2740_v36 = vld [vmem:[%s3557_s20 + $0x34] ss:$8 sps:$4 sm:$0xff]   ;;  %v2748_v4 = vld [vmem:[%s3557_s20 + $0x10] ss:$8 sps:$4 sm:$0xff]   ;;  %v2749_v12 = vld [vmem:[%s3557_s20 + $0x4] ss:$8 sps:$4 sm:$0xff]  }
 0x140   : > { %v540_v14 = vpop.xlane.xlu0 %539  ;;  %v542_v21 = vpop.xlane.xlu1 %541  ;;  %1087 = vmatprep.subr.bf16.mxu0 %v2740_v36  ;;  %v3825_v36 = vld [vmem:[%s3565_s21 + $0xf8] sm:$0xff] }
 0x141   : > { %v660_v18 = vmul.f32 %v3721_v10, %v3721_v10  ;;  %v598_v19 = vmul.f32 0.0078125, %v540_v14  ;;  %v661_v25 = vmul.f32 %v3732_v17, %v3732_v17  ;;  %v599_v26 = vmul.f32 0.0078125, %v542_v21  ;;  %v2751_v14 = vld [vmem:[%s3557_s20] ss:$8 sps:$4 sm:$0xff]  }
 0x143   : > { %692 = vadd.xlane.f32.xlu0 %v658_v6  ;;  %569 = vadd.xlane.f32.xlu1 %v3718_v8  ;;  %v3743_v24 = vsub.f32 %v3641_v38, %v598_v19  ;;  %v3754_v31 = vsub.f32 %v3644_v39, %v599_v26  ;;  %v2742_v38 = vld [vmem:[%s3557_s20 + $0x30] ss:$8 sps:$4 sm:$0xff]  }
 0x144   : > { %v544_v28 = vpop.xlane.xlu0 %543  ;;  %v546_v35 = vpop.xlane.xlu1 %545  ;;  %1088 = vmatpush1.bf16.msra.mxu0 %v2742_v38 }
 0x145   : > { %v662_v32 = vmul.f32 %v3743_v24, %v3743_v24  ;;  %v600_v33 = vmul.f32 0.0078125, %v544_v28  ;;  %v663_v52 = vmul.f32 %v3754_v31, %v3754_v31  ;;  %v601_v53 = vmul.f32 0.0078125, %v546_v35  ;;  %1089 = vmatprep.subr.bf16.mxu0 %v2743_v55  ;;  %v3813_v28 = vld [vmem:[%s3565_s21 + $0xf0] sm:$0xff] }
 0x147   : > { %571 = vadd.xlane.f32.xlu0 %v3726_v13  ;;  %694 = vadd.xlane.f32.xlu1 %v659_v11  ;;  %v3765_v39 = vsub.f32 %v3648_v40, %v600_v33  ;;  %v3776_v40 = vsub.f32 %v3651_v41, %v601_v53 }
 0x148   : > { %v548_v37 = vpop.xlane.xlu0 %547  ;;  %v550_v56 = vpop.xlane.xlu1 %549  ;;  %1090 = vmatpush1.bf16.msra.mxu0 %v2745_v59 }
 0x149   : > { %v664_v60 = vmul.f32 %v3765_v39, %v3765_v39  ;;  %v602_v61 = vmul.f32 0.0078125, %v548_v37  ;;  %v665_v6 = vmul.f32 %v3776_v40, %v3776_v40  ;;  %v603_v7 = vmul.f32 0.0078125, %v550_v56  ;;  %1091 = vmatprep.subr.bf16.mxu0 %v2746_v1 }
 0x14b   : > { %573 = vadd.xlane.f32.xlu1 %v3737_v20  ;;  %696 = vadd.xlane.f32.xlu0 %v660_v18  ;;  %v3787_v41 = vsub.f32 %v3656_v42, %v602_v61  ;;  %v3798_v15 = vsub.f32 %v3661_v43, %v603_v7  ;;  %v3803_v18 = vld [vmem:[%s3565_s21 + $0xe8] sm:$0xff] }
 0x14c   : > { %v552_v58 = vpop.xlane.xlu0 %551  ;;  %v554_v3 = vpop.xlane.xlu1 %553  ;;  %1092 = vmatpush1.bf16.msra.mxu0 %v2748_v4 }
 0x14d   : > { %v666_v42 = vmul.f32 %v3787_v41, %v3787_v41  ;;  %v604_v16 = vmul.f32 0.0078125, %v552_v58  ;;  %1093 = vmatprep.subr.bf16.mxu0 %v2749_v12  ;;  %v605_v21 = vmul.f32 0.0078125, %v554_v3 }
 0x14f   : > { %698 = vadd.xlane.f32.xlu1 %v661_v25  ;;  %575 = vadd.xlane.f32.xlu0 %v3748_v27  ;;  %v3808_v43 = vsub.f32 %v3664_v44, %v604_v16  ;;  %v667_v25 = vmul.f32 %v3798_v15, %v3798_v15  ;;  %v3816_v29 = vsub.f32 %v3667_v45, %v605_v21 }
 0x150   : > { %v556_v11 = vpop.xlane.xlu0 %555  ;;  %v558_v19 = vpop.xlane.xlu1 %557  ;;  %1094 = vmatpush1.bf16.msra.mxu0 %v2751_v14 }
 0x151   : > { %v606_v26 = vmul.f32 0.0078125, %v556_v11  ;;  %v607_v30 = vmul.f32 0.0078125, %v558_v19  ;;  %v668_v44 = vmul.f32 %v3808_v43, %v3808_v43  ;;  %v669_v45 = vmul.f32 %v3816_v29, %v3816_v29 }
 0x153   : > { %577 = vadd.xlane.f32.xlu1 %v3759_v34  ;;  %700 = vadd.xlane.f32.xlu0 %v662_v32  ;;  %v3820_v33 = vsub.f32 %v3674_v46, %v606_v26  ;;  %v3828_v38 = vsub.f32 %v3677_v47, %v607_v30 }
 0x154   : > { %v560_v22 = vpop.xlane.xlu0 %559  ;;  %v562_v32 = vpop.xlane.xlu1 %561 }
 0x155   : > { %v608_v35 = vmul.f32 0.0078125, %v560_v22  ;;  %v670_v46 = vmul.f32 %v3820_v33, %v3820_v33  ;;  %v609_v53 = vmul.f32 0.0078125, %v562_v32  ;;  %v671_v58 = vmul.f32 %v3828_v38, %v3828_v38 }
 0x157   : > { %702 = vadd.xlane.f32.xlu1 %v663_v52  ;;  %579 = vadd.xlane.f32.xlu0 %v3770_v54  ;;  %v3834_v52 = vsub.f32 %v3682_v48, %v608_v35  ;;  %v3841_v47 = vsub.f32 %v3685_v49, %v609_v53 }
 0x158   : > { %v564_v37 = vpop.xlane.xlu0 %563  ;;  %v566_v56 = vpop.xlane.xlu1 %565 }
 0x159   : > { %v610_v55 = vmul.f32 0.0078125, %v564_v37  ;;  %v672_v48 = vmul.f32 %v3834_v52, %v3834_v52  ;;  %v673_v1 = vmul.f32 %v3841_v47, %v3841_v47 }
 0x15b   : > { %581 = vadd.xlane.f32.xlu1 %v3781_v62  ;;  %704 = vadd.xlane.f32.xlu0 %v664_v60  ;;  %v3844_v59 = vsub.f32 %v3690_v50, %v610_v55  ;;  %v611_v60 = vmul.f32 0.0078125, %v566_v56 }
 0x15d   : > { %v3849_v61 = vsub.f32 %v3693_v51, %v611_v60  ;;  %v674_v3 = vmul.f32 %v3844_v59, %v3844_v59 }
 0x15f   : > { %706 = vadd.xlane.f32.xlu1 %v665_v6  ;;  %583 = vadd.xlane.f32.xlu0 %v3792_v9  ;;  %v675_v49 = vmul.f32 %v3849_v61, %v3849_v61 }
 0x163   : > { %585 = vadd.xlane.f32.xlu1 %v3803_v18  ;;  %708 = vadd.xlane.f32.xlu0 %v666_v42 }
 0x167   : > { %710 = vadd.xlane.f32.xlu1 %v667_v25  ;;  %587 = vadd.xlane.f32.xlu0 %v3813_v28 }
 0x16b   : > { %589 = vadd.xlane.f32.xlu1 %v3825_v36  ;;  %712 = vadd.xlane.f32.xlu0 %v668_v44 }
 0x16f   : > { %714 = vadd.xlane.f32.xlu1 %v669_v45  ;;  %716 = vadd.xlane.f32.xlu0 %v670_v46 }
 0x173   : > { %718 = vadd.xlane.f32.xlu1 %v671_v58  ;;  %720 = vadd.xlane.f32.xlu0 %v672_v48 }
 0x177   : > { %722 = vadd.xlane.f32.xlu1 %v673_v1  ;;  %724 = vadd.xlane.f32.xlu0 %v674_v3 }
 0x17b   : > { %726 = vadd.xlane.f32.xlu1 %v675_v49 }
 0x1c4   : > { %v689_v50 = vpop.xlane.xlu0 %688 }
 0x1c5   : > { %v752_v4 = vmul.f32 0.0078125, %v689_v50 }
 0x1c7   : > { %v784_v6 = vadd.f32 1e-05, %v752_v4 }
 0x1c8   : > { %v691_v7 = vpop.xlane.xlu1 %690  ;;  %v568_v11 = vpop.xlane.xlu0 %567 }
 0x1c9   : > { %2768 = vrsqrt.f32 %v784_v6  ;;  %v753_v51 = vmul.f32 0.0078125, %v691_v7  ;;  %v612_v12 = vmul.f32 0.0078125, %v568_v11  ;;  %v3879_v7 = vld [vmem:[%s518_s22] ss:$0 sm:$0xff]  ;;  %s2240_s22 = scalar_lea.sflag [#allocation4], %s3541_s1 }
 0x1cb   : > { %v785_v14 = vadd.f32 1e-05, %v753_v51  ;;  %v3858_v42 = vsub.f32 %v3708_v2, %v612_v12 }
 0x1cc   : > { %v570_v16 = vpop.xlane.xlu1 %569  ;;  %v693_v19 = vpop.xlane.xlu0 %692 }
 0x1cd   : > { %2770 = vrsqrt.f32 %v785_v14  ;;  %v613_v21 = vmul.f32 0.0078125, %v570_v16  ;;  %v754_v22 = vmul.f32 0.0078125, %v693_v19  ;;  %v676_v25 = vmul.f32 %v3858_v42, %v3858_v42 }
 0x1cf   : > { %v3863_v26 = vsub.f32 %v3718_v8, %v613_v21  ;;  %v786_v30 = vadd.f32 1e-05, %v754_v22  ;;  %728 = vadd.xlane.f32.xlu0 %v676_v25  ;;  %v3892_v25 = vld [vmem:[%s520_s24] ss:$0 sm:$0xff]  ;;  %s3134_s24 = scalar_lea.vmem %s3133_s2, 8192 }
 0x1d0   : > { %v695_v32 = vpop.xlane.xlu1 %694  ;;  %v572_v44 = vpop.xlane.xlu0 %571  ;;  %p3136_p9 = scmp.lt.s32.totalorder %s3134_s24, %s3128_s27 }
 0x1d1   : > { %2772 = vrsqrt.f32 %v786_v30  ;;  %v755_v35 = vmul.f32 0.0078125, %v695_v32  ;;  %v614_v37 = vmul.f32 0.0078125, %v572_v44  ;;  %v677_v2 = vmul.f32 %v3863_v26, %v3863_v26 }
 0x1d2   : > { %p3137_p1 = por %p3136_p9, %p3135_p5 }
 0x1d3   : > { %v787_v45 = vadd.f32 1e-05, %v755_v35  ;;  %v3868_v46 = vsub.f32 %v3726_v13, %v614_v37  ;;  %730 = vadd.xlane.f32.xlu1 %v677_v2 }
 0x1d4   : > { %v574_v53 = vpop.xlane.xlu1 %573  ;;  %v697_v55 = vpop.xlane.xlu0 %696  ;;  %p3138_p11 = pnand %p3137_p1, %p3131_p12 }
 0x1d5   : > { %2774 = vrsqrt.f32 %v787_v45  ;;  %v615_v8 = vmul.f32 0.0078125, %v574_v53  ;;  %v756_v56 = vmul.f32 0.0078125, %v697_v55  ;;  %v678_v58 = vmul.f32 %v3868_v46, %v3868_v46 }
 0x1d6   : > { %v2769_v48 = vpop.eup %2768 }
 0x1d7   : > { %v3873_v60 = vsub.f32 %v3737_v20, %v615_v8  ;;  %v788_v1 = vadd.f32 1e-05, %v756_v56  ;;  %732 = vadd.xlane.f32.xlu0 %v678_v58  ;;  %v848_v49 = vmul.f32 %v2769_v48, %v3699_v57 }
 0x1d8   : > { %v699_v3 = vpop.xlane.xlu1 %698  ;;  %v576_v13 = vpop.xlane.xlu0 %575 }
 0x1d9   : > { %2776 = vrsqrt.f32 %v788_v1  ;;  %v757_v50 = vmul.f32 0.0078125, %v699_v3  ;;  %v616_v4 = vmul.f32 0.0078125, %v576_v13  ;;  %v679_v6 = vmul.f32 %v3873_v60, %v3873_v60 }
 0x1da   : > { %v2771_v11 = vpop.eup %2770  ;;  %v886_v16 = vmul.f32 %v3879_v7, %v848_v49 }
 0x1db   : > { %v789_v20 = vadd.f32 1e-05, %v757_v50  ;;  %v3886_v51 = vsub.f32 %v3748_v27, %v616_v4  ;;  %734 = vadd.xlane.f32.xlu1 %v679_v6  ;;  %v849_v57 = vmul.f32 %v2771_v11, %v3703_v63 }
 0x1dc   : > { %v578_v12 = vpop.xlane.xlu1 %577  ;;  %v701_v14 = vpop.xlane.xlu0 %700  ;;  %v924_v37 = vadd.f32 %v3892_v25, %v886_v16 }
 0x1dd   : > { %2778 = vrsqrt.f32 %v789_v20  ;;  %v617_v19 = vmul.f32 0.0078125, %v578_v12  ;;  %v758_v21 = vmul.f32 0.0078125, %v701_v14  ;;  %v680_v22 = vmul.f32 %v3886_v51, %v3886_v51 }
 0x1de   : > { %v2773_v30 = vpop.eup %2772  ;;  %v887_v32 = vmul.f32 %v3879_v7, %v849_v57 }
 0x1df   : > { %v3896_v27 = vsub.f32 %v3759_v34, %v617_v19  ;;  %v790_v44 = vadd.f32 1e-05, %v758_v21  ;;  %736 = vadd.xlane.f32.xlu0 %v680_v22  ;;  %v850_v45 = vmul.f32 %v2773_v30, %v3705_v0 }
 0x1e0   : > { %v703_v63 = vpop.xlane.xlu1 %702  ;;  %v580_v35 = vpop.xlane.xlu0 %579  ;;  %v925_v2 = vadd.f32 %v3892_v25, %v887_v32 }
 0x1e1   : > { %2780 = vrsqrt.f32 %v790_v44  ;;  %v759_v53 = vmul.f32 0.0078125, %v703_v63  ;;  %v618_v55 = vmul.f32 0.0078125, %v580_v35  ;;  %v681_v8 = vmul.f32 %v3896_v27, %v3896_v27 }
 0x1e2   : > { %v2775_v56 = vpop.eup %2774  ;;  %v956_v58 = vpack.c.bf16 %v925_v2, %v924_v37  ;;  %v888_v0 = vmul.f32 %v3879_v7, %v850_v45 }
 0x1e3   : > { %v791_v34 = vadd.f32 1e-05, %v759_v53  ;;  %v3904_v48 = vsub.f32 %v3770_v54, %v618_v55  ;;  %738 = vadd.xlane.f32.xlu1 %v681_v8  ;;  %v851_v1 = vmul.f32 %v2775_v56, %v3713_v5 }
 0x1e4   : > { %1112 = vmatmul.mubr.bf16.vlgmr.msra.gmra.mxu0 %v956_v58  ;;  %v582_v3 = vpop.xlane.xlu1 %581  ;;  %v705_v13 = vpop.xlane.xlu0 %704  ;;  %v926_v12 = vadd.f32 %v3892_v25, %v888_v0 }
 0x1e5   : > { %2782 = vrsqrt.f32 %v791_v34  ;;  %v619_v49 = vmul.f32 0.0078125, %v582_v3  ;;  %v760_v50 = vmul.f32 0.0078125, %v705_v13  ;;  %v682_v4 = vmul.f32 %v3904_v48, %v3904_v48  ;;  %1121 = vmatprep.mubr.bf16.mxu0 %v3271_v23 }
 0x1e6   : > { %v2777_v6 = vpop.eup %2776  ;;  %v889_v54 = vmul.f32 %v3879_v7, %v851_v1 }
 0x1e7   : > { %v3913_v11 = vsub.f32 %v3781_v62, %v619_v49  ;;  %v792_v5 = vadd.f32 1e-05, %v760_v50  ;;  %740 = vadd.xlane.f32.xlu0 %v682_v4  ;;  %v852_v16 = vmul.f32 %v2777_v6, %v3721_v10 }
 0x1e8   : > { %v707_v20 = vpop.xlane.xlu1 %706  ;;  %v584_v57 = vpop.xlane.xlu0 %583  ;;  %v927_v14 = vadd.f32 %v3892_v25, %v889_v54 }
 0x1e9   : > { %2784 = vrsqrt.f32 %v792_v5  ;;  %v761_v19 = vmul.f32 0.0078125, %v707_v20  ;;  %v620_v21 = vmul.f32 0.0078125, %v584_v57  ;;  %v683_v22 = vmul.f32 %v3913_v11, %v3913_v11 }
 0x1ea   : > { %v2779_v30 = vpop.eup %2778  ;;  %v957_v32 = vpack.c.bf16 %v927_v14, %v926_v12  ;;  %v890_v10 = vmul.f32 %v3879_v7, %v852_v16 }
 0x1eb   : > { %v793_v62 = vadd.f32 1e-05, %v761_v19  ;;  %v3921_v44 = vsub.f32 %v3792_v9, %v620_v21  ;;  %742 = vadd.xlane.f32.xlu1 %v683_v22  ;;  %v853_v63 = vmul.f32 %v2779_v30, %v3732_v17 }
 0x1ec   : > { %1122 = vmatmul.mubr.bf16.gmra.mxu0 %v957_v32  ;;  %v586_v35 = vpop.xlane.xlu1 %585  ;;  %v709_v37 = vpop.xlane.xlu0 %708  ;;  %v928_v34 = vadd.f32 %v3892_v25, %v890_v10 }
 0x1ed   : > { %2786 = vrsqrt.f32 %v793_v62  ;;  %v621_v2 = vmul.f32 0.0078125, %v586_v35  ;;  %v762_v45 = vmul.f32 0.0078125, %v709_v37  ;;  %v684_v53 = vmul.f32 %v3921_v44, %v3921_v44  ;;  %1131 = vmatprep.mubr.bf16.mxu0 %v3271_v23 }
 0x1ee   : > { %v2781_v55 = vpop.eup %2780  ;;  %v891_v9 = vmul.f32 %v3879_v7, %v853_v63 }
 0x1ef   : > { %v3930_v8 = vsub.f32 %v3803_v18, %v621_v2  ;;  %v794_v17 = vadd.f32 1e-05, %v762_v45  ;;  %744 = vadd.xlane.f32.xlu0 %v684_v53  ;;  %v854_v3 = vmul.f32 %v2781_v55, %v3743_v24 }
 0x1f0   : > { %v711_v56 = vpop.xlane.xlu1 %710  ;;  %v588_v58 = vpop.xlane.xlu0 %587  ;;  %v929_v1 = vadd.f32 %v3892_v25, %v891_v9 }
 0x1f1   : > { %2788 = vrsqrt.f32 %v794_v17  ;;  %v763_v13 = vmul.f32 0.0078125, %v711_v56  ;;  %v622_v0 = vmul.f32 0.0078125, %v588_v58  ;;  %v685_v49 = vmul.f32 %v3930_v8, %v3930_v8 }
 0x1f2   : > { %v2783_v50 = vpop.eup %2782  ;;  %v958_v4 = vpack.c.bf16 %v929_v1, %v928_v34  ;;  %v892_v24 = vmul.f32 %v3879_v7, %v854_v3 }
 0x1f3   : > { %v795_v18 = vadd.f32 1e-05, %v763_v13  ;;  %v3938_v6 = vsub.f32 %v3813_v28, %v622_v0  ;;  %746 = vadd.xlane.f32.xlu1 %v685_v49  ;;  %v855_v54 = vmul.f32 %v2783_v50, %v3754_v31 }
 0x1f4   : > { %1132 = vmatmul.mubr.bf16.gmra.mxu0 %v958_v4  ;;  %v590_v5 = vpop.xlane.xlu1 %589  ;;  %v713_v20 = vpop.xlane.xlu0 %712  ;;  %v930_v32 = vadd.f32 %v3892_v25, %v892_v24 }
 0x1f5   : > { %2790 = vrsqrt.f32 %v795_v18  ;;  %v623_v57 = vmul.f32 0.0078125, %v590_v5  ;;  %v764_v12 = vmul.f32 0.0078125, %v713_v20  ;;  %v686_v14 = vmul.f32 %v3938_v6, %v3938_v6  ;;  %1141 = vmatprep.mubr.bf16.mxu0 %v3271_v23 }
 0x1f6   : > { %v2785_v16 = vpop.eup %2784  ;;  %v893_v28 = vmul.f32 %v3879_v7, %v855_v54 }
 0x1f7   : > { %v3947_v19 = vsub.f32 %v3825_v36, %v623_v57  ;;  %v796_v31 = vadd.f32 1e-05, %v764_v12  ;;  %748 = vadd.xlane.f32.xlu0 %v686_v14  ;;  %v856_v21 = vmul.f32 %v2785_v16, %v3765_v39 }
 0x1f8   : > { %v715_v22 = vpop.xlane.xlu1 %714  ;;  %v717_v30 = vpop.xlane.xlu0 %716  ;;  %v931_v62 = vadd.f32 %v3892_v25, %v893_v28 }
 0x1f9   : > { %2792 = vrsqrt.f32 %v796_v31  ;;  %v765_v63 = vmul.f32 0.0078125, %v715_v22  ;;  %v766_v35 = vmul.f32 0.0078125, %v717_v30  ;;  %v687_v37 = vmul.f32 %v3947_v19, %v3947_v19 }
 0x1fa   : > { %v2787_v10 = vpop.eup %2786  ;;  %v959_v2 = vpack.c.bf16 %v931_v62, %v930_v32  ;;  %v894_v39 = vmul.f32 %v3879_v7, %v856_v21 }
 0x1fb   : > { %v797_v36 = vadd.f32 1e-05, %v765_v63  ;;  %750 = vadd.xlane.f32.xlu1 %v687_v37  ;;  %v857_v45 = vmul.f32 %v2787_v10, %v3776_v40  ;;  %v798_v53 = vadd.f32 1e-05, %v766_v35 }
 0x1fc   : > { %1142 = vmatmul.mubr.bf16.gmra.mxu0 %v959_v2  ;;  %v719_v55 = vpop.xlane.xlu1 %718  ;;  %v721_v17 = vpop.xlane.xlu0 %720  ;;  %v932_v1 = vadd.f32 %v3892_v25, %v894_v39 }
 0x1fd   : > { %2794 = vrsqrt.f32 %v797_v36  ;;  %v767_v9 = vmul.f32 0.0078125, %v719_v55  ;;  %1151 = vmatprep.mubr.bf16.mxu0 %v3271_v23  ;;  %v895_v56 = vmul.f32 %v3879_v7, %v857_v45  ;;  %v768_v13 = vmul.f32 0.0078125, %v721_v17 }
 0x1fe   : > { %v2789_v58 = vpop.eup %2788  ;;  %2796 = vrsqrt.f32 %v798_v53 }
 0x1ff   : > { %v799_v34 = vadd.f32 1e-05, %v767_v9  ;;  %v933_v3 = vadd.f32 %v3892_v25, %v895_v56  ;;  %v858_v40 = vmul.f32 %v2789_v58, %v3787_v41  ;;  %v800_v20 = vadd.f32 1e-05, %v768_v13 }
 0x200   : > { %v723_v0 = vpop.xlane.xlu1 %722  ;;  %v725_v57 = vpop.xlane.xlu0 %724 }
 0x201   : > { %2798 = vrsqrt.f32 %v799_v34  ;;  %v769_v49 = vmul.f32 0.0078125, %v723_v0  ;;  %v960_v50 = vpack.c.bf16 %v933_v3, %v932_v1  ;;  %v896_v5 = vmul.f32 %v3879_v7, %v858_v40 }
 0x202   : > { %v2791_v4 = vpop.eup %2790 }
 0x203   : > { %v801_v18 = vadd.f32 1e-05, %v769_v49  ;;  %v859_v54 = vmul.f32 %v2791_v4, %v3798_v15  ;;  %v934_v16 = vadd.f32 %v3892_v25, %v896_v5  ;;  %v770_v15 = vmul.f32 0.0078125, %v725_v57  ;;  %v2753_v5 = vld [vmem:[%s3563_s14 + $0x38] sm:$0xff]   ;;  %v2756_v57 = vld [vmem:[%s3563_s14 + $0x68] sm:$0xff]  }
 0x204   : > { %1152 = vmatmul.mubr.bf16.gmra.mxu0 %v960_v50  ;;  %v727_v24 = vpop.xlane.xlu1 %726 }
 0x205   : > { %1161 = vmatprep.mubr.bf16.mxu0 %v3271_v23  ;;  %v897_v41 = vmul.f32 %v3879_v7, %v859_v54  ;;  %2800 = vrsqrt.f32 %v801_v18  ;;  %v771_v14 = vmul.f32 0.0078125, %v727_v24  ;;  %v802_v63 = vadd.f32 1e-05, %v770_v15  ;;  %v2755_v24 = vld [vmem:[%s3563_s14 + $0x30] sm:$0xff]  }
 0x206   : > { %v2793_v12 = vpop.eup %2792  ;;  %2802 = vrsqrt.f32 %v800_v20  ;;  %v2754_v20 = vld [vmem:[%s3563_s14 + $0x70] sm:$0xff]  }
 0x207   : > { %v935_v28 = vadd.f32 %v3892_v25, %v897_v41  ;;  %v860_v31 = vmul.f32 %v2793_v12, %v3808_v43  ;;  %v803_v30 = vadd.f32 1e-05, %v771_v14  ;;  %v2757_v41 = vld [vmem:[%s3563_s14 + $0x28] sm:$0xff]   ;;  %v2758_v12 = vld [vmem:[%s3563_s14 + $0x60] sm:$0xff]   ;;  %v2763_v15 = vld [vmem:[%s3563_s14 + $0x10] sm:$0xff]  }
 0x208   : > { %v2759_v14 = vld [vmem:[%s3563_s14 + $0x20] sm:$0xff]  }
 0x209   : > { %v961_v21 = vpack.c.bf16 %v935_v28, %v934_v16  ;;  %v898_v62 = vmul.f32 %v3879_v7, %v860_v31  ;;  %2804 = vrsqrt.f32 %v803_v30  ;;  %v2760_v16 = vld [vmem:[%s3563_s14 + $0x58] sm:$0xff]   ;;  %v2762_v31 = vld [vmem:[%s3563_s14 + $0x50] sm:$0xff]   ;;  %v2766_v30 = vld [vmem:[%s3563_s14 + $0x40] sm:$0xff]  }
 0x20a   : > { %v2795_v22 = vpop.eup %2794  ;;  %2806 = vrsqrt.f32 %v802_v63  ;;  %v2761_v28 = vld [vmem:[%s3563_s14 + $0x18] sm:$0xff]  }
 0x20b   : > { %v861_v32 = vmul.f32 %v2795_v22, %v3816_v29  ;;  %v2797_v35 = vpop.eup %2796  ;;  %v936_v43 = vadd.f32 %v3892_v25, %v898_v62  ;;  %v2765_v22 = vld [vmem:[%s3563_s14 + $0x8] sm:$0xff]  }
 0x20c   : > { %1162 = vmatmul.mubr.bf16.gmra.mxu0 %v961_v21  ;;  %v862_v29 = vmul.f32 %v2797_v35, %v3820_v33  ;;  %v2764_v21 = vld [vmem:[%s3563_s14 + $0x48] sm:$0xff]  }
 0x20d   : > { %1171 = vmatprep.mubr.bf16.mxu0 %v3271_v23  ;;  %v899_v37 = vmul.f32 %v3879_v7, %v861_v32  ;;  %v2767_v32 = vld [vmem:[%s3563_s14] sm:$0xff]  }
 0x20e   : > { %v2799_v10 = vpop.eup %2798  ;;  %v900_v55 = vmul.f32 %v3879_v7, %v862_v29 }
 0x20f   : > { %v937_v2 = vadd.f32 %v3892_v25, %v899_v37  ;;  %v863_v36 = vmul.f32 %v2799_v10, %v3828_v38 }
 0x210   : > { %v938_v58 = vadd.f32 %v3892_v25, %v900_v55 }
 0x211   : > { %v962_v45 = vpack.c.bf16 %v937_v2, %v936_v43  ;;  %v901_v39 = vmul.f32 %v3879_v7, %v863_v36 }
 0x212   : > { %v2801_v53 = vpop.eup %2800 }
 0x213   : > { %v2803_v9 = vpop.eup %2802  ;;  %v939_v17 = vadd.f32 %v3892_v25, %v901_v39  ;;  %v865_v56 = vmul.f32 %v2801_v53, %v3841_v47 }
 0x214   : > { %1172 = vmatmul.mubr.bf16.gmra.mxu0 %v962_v45  ;;  %v864_v38 = vmul.f32 %v2803_v9, %v3834_v52 }
 0x215   : > { %1181 = vmatprep.mubr.bf16.mxu0 %v3271_v23  ;;  %v963_v34 = vpack.c.bf16 %v939_v17, %v938_v58  ;;  %v903_v33 = vmul.f32 %v3879_v7, %v865_v56 }
 0x216   : > { %v2805_v1 = vpop.eup %2804  ;;  %v902_v3 = vmul.f32 %v3879_v7, %v864_v38 }
 0x217   : > { %v2807_v40 = vpop.eup %2806  ;;  %v941_v13 = vadd.f32 %v3892_v25, %v903_v33  ;;  %v867_v47 = vmul.f32 %v2805_v1, %v3849_v61 }
 0x218   : > { %v940_v0 = vadd.f32 %v3892_v25, %v902_v3  ;;  %v866_v52 = vmul.f32 %v2807_v40, %v3844_v59  ;;  %v2752_v59 = vld [vmem:[%s3563_s14 + $0x78] sm:$0xff]  }
 0x219   : > { %v905_v50 = vmul.f32 %v3879_v7, %v867_v47  ;;  %2472 = vmatprep.subr.bf16.mxu1 %v2752_v59 }
 0x21a   : > { %v964_v49 = vpack.c.bf16 %v941_v13, %v940_v0  ;;  %v904_v4 = vmul.f32 %v3879_v7, %v866_v52  ;;  %2473 = vmatpush3.bf16.msra.mxu1 %v2753_v5 }
 0x21b   : > { %v943_v18 = vadd.f32 %v3892_v25, %v905_v50  ;;  %2474 = vmatprep.subr.bf16.mxu1 %v2754_v20 }
 0x21c   : > { %1182 = vmatmul.mubr.bf16.gmra.mxu0 %v963_v34  ;;  %v942_v61 = vadd.f32 %v3892_v25, %v904_v4 }
 0x21d   : > { %1191 = vmatprep.mubr.bf16.mxu0 %v3271_v23 }
 0x21e   : > { %v965_v54 = vpack.c.bf16 %v943_v18, %v942_v61  ;;  %2475 = vmatpush3.bf16.msra.mxu1 %v2755_v24 }
 0x21f   : > { %2476 = vmatprep.subr.bf16.mxu1 %v2756_v57 }
 0x222   : > { %2477 = vmatpush3.bf16.msra.mxu1 %v2757_v41 }
 0x223   : > { %2478 = vmatprep.subr.bf16.mxu1 %v2758_v12 }
 0x224   : > { %1192 = vmatmul.mubr.bf16.gmra.mxu0 %v964_v49 }
 0x225   : > { %1201 = vmatprep.mubr.bf16.mxu0 %v3271_v23 }
 0x226   : > { %2479 = vmatpush3.bf16.msra.mxu1 %v2759_v14 }
 0x227   : > { %2480 = vmatprep.subr.bf16.mxu1 %v2760_v16 }
 0x22a   : > { %2481 = vmatpush3.bf16.msra.mxu1 %v2761_v28 }
 0x22b   : > { %2482 = vmatprep.subr.bf16.mxu1 %v2762_v31 }
 0x22c   : > { %1202 = vmatmul.mubr.bf16.gmra.mxu0 %v965_v54 }
 0x22d   : > { %1211 = vmatprep.mubr.bf16.mxu0 %v3271_v23 }
 0x22e   : > { %2483 = vmatpush3.bf16.msra.mxu1 %v2763_v15 }
 0x22f   : > { %2484 = vmatprep.subr.bf16.mxu1 %v2764_v21 }
 0x232   : > { %2485 = vmatpush3.bf16.msra.mxu1 %v2765_v22 }
 0x233   : > { %2486 = vmatprep.subr.bf16.mxu1 %v2766_v30 }
 0x236   : > { %2487 = vmatpush3.bf16.msra.mxu1 %v2767_v32 }
 0x258   : > { %v729_v62 = vpop.xlane.xlu0 %728 }
 0x259   : > { %v772_v63 = vmul.f32 0.0078125, %v729_v62 }
 0x25b   : > { %v804_v35 = vadd.f32 1e-05, %v772_v63 }
 0x25c   : > { %v731_v37 = vpop.xlane.xlu1 %730 }
 0x25d   : > { %2808 = vrsqrt.f32 %v804_v35  ;;  %v773_v10 = vmul.f32 0.0078125, %v731_v37 }
 0x25f   : > { %v805_v43 = vadd.f32 1e-05, %v773_v10 }
 0x260   : > { %v733_v2 = vpop.xlane.xlu0 %732 }
 0x261   : > { %2810 = vrsqrt.f32 %v805_v43  ;;  %v774_v36 = vmul.f32 0.0078125, %v733_v2 }
 0x263   : > { %v806_v29 = vadd.f32 1e-05, %v774_v36 }
 0x264   : > { %v735_v45 = vpop.xlane.xlu1 %734 }
 0x265   : > { %2812 = vrsqrt.f32 %v806_v29  ;;  %v775_v39 = vmul.f32 0.0078125, %v735_v45 }
 0x267   : > { %v807_v53 = vadd.f32 1e-05, %v775_v39 }
 0x268   : > { %v737_v55 = vpop.xlane.xlu0 %736 }
 0x269   : > { %2814 = vrsqrt.f32 %v807_v53  ;;  %v776_v9 = vmul.f32 0.0078125, %v737_v55 }
 0x26a   : > { %v2809_v17 = vpop.eup %2808 }
 0x26b   : > { %v808_v56 = vadd.f32 1e-05, %v776_v9  ;;  %v868_v58 = vmul.f32 %v2809_v17, %v3858_v42 }
 0x26c   : > { %v739_v38 = vpop.xlane.xlu1 %738 }
 0x26d   : > { %2816 = vrsqrt.f32 %v808_v56  ;;  %v777_v34 = vmul.f32 0.0078125, %v739_v38  ;;  %v906_v40 = vmul.f32 %v3879_v7, %v868_v58 }
 0x26e   : > { %v2811_v33 = vpop.eup %2810 }
 0x26f   : > { %v809_v1 = vadd.f32 1e-05, %v777_v34  ;;  %v869_v3 = vmul.f32 %v2811_v33, %v3863_v26  ;;  %v944_v50 = vadd.f32 %v3892_v25, %v906_v40 }
 0x270   : > { %v741_v13 = vpop.xlane.xlu0 %740 }
 0x271   : > { %2818 = vrsqrt.f32 %v809_v1  ;;  %v778_v47 = vmul.f32 0.0078125, %v741_v13  ;;  %v907_v0 = vmul.f32 %v3879_v7, %v869_v3 }
 0x272   : > { %v2813_v52 = vpop.eup %2812 }
 0x273   : > { %v810_v49 = vadd.f32 1e-05, %v778_v47  ;;  %v945_v42 = vadd.f32 %v3892_v25, %v907_v0  ;;  %v870_v4 = vmul.f32 %v2813_v52, %v3868_v46  ;;  %v989_v0 = vlaneseq }
 0x274   : > { %v743_v18 = vpop.xlane.xlu1 %742 }
 0x275   : > { %2820 = vrsqrt.f32 %v810_v49  ;;  %v779_v61 = vmul.f32 0.0078125, %v743_v18  ;;  %v966_v54 = vpack.c.bf16 %v945_v42, %v944_v50  ;;  %v908_v20 = vmul.f32 %v3879_v7, %v870_v4 }
 0x276   : > { %v2815_v26 = vpop.eup %2814  ;;  %v990_v42 = vshrl.u32 %v989_v0, 7 }
 0x277   : > { %v811_v59 = vadd.f32 1e-05, %v779_v61  ;;  %1212 = vmatmul.mubr.bf16.gmra.mxu0 %v966_v54  ;;  %v871_v5 = vmul.f32 %v2815_v26, %v3873_v60  ;;  %v946_v14 = vadd.f32 %v3892_v25, %v908_v20  ;;  %v524_v54 = vld [vmem:[%s523_s30] sm:$0x3] }
 0x278   : > { %v745_v24 = vpop.xlane.xlu0 %744  ;;  %1221 = vmatprep.mubr.bf16.mxu0 %v3271_v23  ;;  %v995_v26 = vsub.s32 1, %v990_v42 }
 0x279   : > { %2822 = vrsqrt.f32 %v811_v59  ;;  %v780_v57 = vmul.f32 0.0078125, %v745_v24  ;;  %v909_v41 = vmul.f32 %v3879_v7, %v871_v5 }
 0x27a   : > { %v2817_v12 = vpop.eup %2816 }
 0x27b   : > { %v812_v46 = vadd.f32 1e-05, %v780_v57  ;;  %v947_v16 = vadd.f32 %v3892_v25, %v909_v41  ;;  %v872_v28 = vmul.f32 %v2817_v12, %v3886_v51 }
 0x27c   : > { %v747_v31 = vpop.xlane.xlu1 %746 }
 0x27d   : > { %2824 = vrsqrt.f32 %v812_v46  ;;  %v781_v60 = vmul.f32 0.0078125, %v747_v31  ;;  %v967_v15 = vpack.c.bf16 %v947_v16, %v946_v14  ;;  %v910_v32 = vmul.f32 %v3879_v7, %v872_v28 }
 0x27e   : > { %v2819_v21 = vpop.eup %2818 }
 0x27f   : > { %v813_v22 = vadd.f32 1e-05, %v781_v60  ;;  %1222 = vmatmul.mubr.bf16.gmra.mxu0 %v967_v15  ;;  %v873_v30 = vmul.f32 %v2819_v21, %v3896_v27  ;;  %v948_v10 = vadd.f32 %v3892_v25, %v910_v32 }
 0x280   : > { %v749_v62 = vpop.xlane.xlu0 %748  ;;  %1231 = vmatprep.mubr.bf16.mxu0 %v3271_v23 }
 0x281   : > { %2826 = vrsqrt.f32 %v813_v22  ;;  %v782_v63 = vmul.f32 0.0078125, %v749_v62  ;;  %v911_v35 = vmul.f32 %v3879_v7, %v873_v30 }
 0x282   : > { %v2821_v37 = vpop.eup %2820 }
 0x283   : > { %v814_v51 = vadd.f32 1e-05, %v782_v63  ;;  %v949_v43 = vadd.f32 %v3892_v25, %v911_v35  ;;  %v874_v2 = vmul.f32 %v2821_v37, %v3904_v48 }
 0x284   : > { %v751_v36 = vpop.xlane.xlu1 %750 }
 0x285   : > { %2828 = vrsqrt.f32 %v814_v51  ;;  %v783_v27 = vmul.f32 0.0078125, %v751_v36  ;;  %v968_v29 = vpack.c.bf16 %v949_v43, %v948_v10  ;;  %v912_v55 = vmul.f32 %v3879_v7, %v874_v2 }
 0x286   : > { %v2823_v45 = vpop.eup %2822 }
 0x287   : > { %v815_v39 = vadd.f32 1e-05, %v783_v27  ;;  %1232 = vmatmul.mubr.bf16.gmra.mxu0 %v968_v29  ;;  %v875_v53 = vmul.f32 %v2823_v45, %v3913_v11  ;;  %v950_v56 = vadd.f32 %v3892_v25, %v912_v55 }
 0x288   : > { %1241 = vmatprep.mubr.bf16.mxu0 %v3271_v23 }
 0x289   : > { %2830 = vrsqrt.f32 %v815_v39  ;;  %v913_v9 = vmul.f32 %v3879_v7, %v875_v53 }
 0x28a   : > { %v2825_v17 = vpop.eup %2824 }
 0x28b   : > { %v951_v48 = vadd.f32 %v3892_v25, %v913_v9  ;;  %v876_v58 = vmul.f32 %v2825_v17, %v3921_v44 }
 0x28d   : > { %v969_v38 = vpack.c.bf16 %v951_v48, %v950_v56  ;;  %v914_v33 = vmul.f32 %v3879_v7, %v876_v58 }
 0x28e   : > { %v2827_v34 = vpop.eup %2826 }
 0x28f   : > { %1242 = vmatmul.mubr.bf16.gmra.mxu0 %v969_v38  ;;  %v877_v11 = vmul.f32 %v2827_v34, %v3930_v8  ;;  %v952_v40 = vadd.f32 %v3892_v25, %v914_v33 }
 0x290   : > { %1251 = vmatprep.mubr.bf16.mxu0 %v3271_v23 }
 0x291   : > { %v915_v1 = vmul.f32 %v3879_v7, %v877_v11 }
 0x292   : > { %v2829_v3 = vpop.eup %2828 }
 0x293   : > { %v953_v13 = vadd.f32 %v3892_v25, %v915_v1  ;;  %v878_v47 = vmul.f32 %v2829_v3, %v3938_v6  ;;  %v991_v6 = vsub.s32 0, %v990_v42 }
 0x295   : > { %v970_v44 = vpack.c.bf16 %v953_v13, %v952_v40  ;;  %v916_v8 = vmul.f32 %v3879_v7, %v878_v47  ;;  %v4054_v59 = vrot.slane %v524_v54, %v991_v6 }
 0x296   : > { %v2831_v52 = vpop.eup %2830 }
 0x297   : > { %1252 = vmatmul.mubr.bf16.gmra.mxu0 %v970_v44  ;;  %v879_v49 = vmul.f32 %v2831_v52, %v3947_v19  ;;  %v954_v4 = vadd.f32 %v3892_v25, %v916_v8  ;;  %v4056_v19 = vrot.slane %v524_v54, %v995_v26 }
 0x298   : > { %1261 = vmatprep.mubr.bf16.mxu0 %v3271_v23 }
 0x299   : > { %v917_v50 = vmul.f32 %v3879_v7, %v879_v49 }
 0x29b   : > { %v955_v18 = vadd.f32 %v3892_v25, %v917_v50 }
 0x29d   : > { %v971_v61 = vpack.c.bf16 %v955_v18, %v954_v4 }
 0x29f   : > { %1262 = vmatmul.mubr.bf16.gmra.mxu0 %v971_v61 }
 0x2a4   : > { %v1113_v5 = vpop.f32.mrf.mxu0 }
 0x2a5   : > { %v4059_v23 = vadd.f32 %v1113_v5, %v4054_v59 }
 0x2a6   : > { %v1115_v7 = vpop.f32.mrf.mxu0 }
 0x2a7   : > { %v1272_v20 = vmul.f32 %v4059_v23, %v4059_v23  ;;  %v4064_v25 = vadd.f32 %v1115_v7, %v4056_v19 }
 0x2a8   : > { %v1117_v24 = vpop.f32.mrf.mxu0 }
 0x2a9   : > { %v1273_v57 = vmul.f32 %v4064_v25, %v4064_v25  ;;  %v4069_v41 = vadd.f32 %v1117_v24, %v4054_v59  ;;  %v1336_v12 = vmul.f32 %v1272_v20, %v4059_v23 }
 0x2aa   : > { %v1119_v46 = vpop.f32.mrf.mxu0 }
 0x2ab   : > { %v1337_v14 = vmul.f32 %v1273_v57, %v4064_v25  ;;  %v1274_v16 = vmul.f32 %v4069_v41, %v4069_v41  ;;  %v4076_v28 = vadd.f32 %v1119_v46, %v4056_v19  ;;  %v1400_v22 = vmul.f32 0.044715, %v1336_v12 }
 0x2ac   : > { %v1123_v31 = vpop.f32.mrf.mxu0 }
 0x2ad   : > { %v1401_v60 = vmul.f32 0.044715, %v1337_v14  ;;  %v1338_v15 = vmul.f32 %v1274_v16, %v4069_v41  ;;  %v1275_v21 = vmul.f32 %v4076_v28, %v4076_v28  ;;  %v4082_v30 = vadd.f32 %v1123_v31, %v4054_v59 }
 0x2ae   : > { %v1125_v32 = vpop.f32.mrf.mxu0  ;;  %v1464_v36 = vadd.f32 %v1400_v22, %v4059_v23 }
 0x2af   : > { %v1465_v62 = vadd.f32 %v1401_v60, %v4064_v25  ;;  %v1339_v63 = vmul.f32 %v1275_v21, %v4076_v28  ;;  %v1402_v35 = vmul.f32 0.044715, %v1338_v15  ;;  %v1276_v37 = vmul.f32 %v4082_v30, %v4082_v30 }
 0x2b0   : > { %v4089_v51 = vadd.f32 %v1125_v32, %v4056_v19  ;;  %v1127_v10 = vpop.f32.mrf.mxu0  ;;  %v1528_v33 = vmul.f32 0.7978846, %v1464_v36 }
 0x2b1   : > { %v1403_v43 = vmul.f32 0.044715, %v1339_v63  ;;  %v4092_v2 = vadd.f32 %v1127_v10, %v4054_v59  ;;  %v1340_v27 = vmul.f32 %v1276_v37, %v4082_v30  ;;  %v1529_v39 = vmul.f32 0.7978846, %v1465_v62 }
 0x2b2   : > { %v1277_v29 = vmul.f32 %v4089_v51, %v4089_v51  ;;  %v1129_v45 = vpop.f32.mrf.mxu0  ;;  %v1466_v17 = vadd.f32 %v1402_v35, %v4069_v41 }
 0x2b3   : > { %v1467_v53 = vadd.f32 %v1403_v43, %v4076_v28  ;;  %v1278_v55 = vmul.f32 %v4092_v2, %v4092_v2  ;;  %v4102_v9 = vadd.f32 %v1129_v45, %v4056_v19  ;;  %v1404_v56 = vmul.f32 0.044715, %v1340_v27 }
 0x2b4   : > { %v1341_v48 = vmul.f32 %v1277_v29, %v4089_v51  ;;  %v1133_v58 = vpop.f32.mrf.mxu0  ;;  %2832 = vtanh.f32 %v1529_v39  ;;  %v1530_v49 = vmul.f32 0.7978846, %v1466_v17 }
 0x2b5   : > { %v1342_v38 = vmul.f32 %v1278_v55, %v4092_v2  ;;  %v1279_v34 = vmul.f32 %v4102_v9, %v4102_v9  ;;  %v4110_v11 = vadd.f32 %v1133_v58, %v4054_v59  ;;  %v1468_v1 = vadd.f32 %v1404_v56, %v4082_v30 }
 0x2b6   : > { %v1405_v3 = vmul.f32 0.044715, %v1341_v48  ;;  %v1135_v40 = vpop.f32.mrf.mxu0  ;;  %v1531_v13 = vmul.f32 0.7978846, %v1467_v53 }
 0x2b7   : > { %v1406_v47 = vmul.f32 0.044715, %v1342_v38  ;;  %v1343_v44 = vmul.f32 %v1279_v34, %v4102_v9  ;;  %v1280_v0 = vmul.f32 %v4110_v11, %v4110_v11  ;;  %v4117_v52 = vadd.f32 %v1135_v40, %v4056_v19 }
 0x2b8   : > { %v1532_v8 = vmul.f32 0.7978846, %v1468_v1  ;;  %v1469_v50 = vadd.f32 %v1405_v3, %v4089_v51  ;;  %v1137_v42 = vpop.f32.mrf.mxu0  ;;  %2834 = vtanh.f32 %v1531_v13 }
 0x2b9   : > { %v1470_v4 = vadd.f32 %v1406_v47, %v4092_v2  ;;  %v1407_v18 = vmul.f32 0.044715, %v1343_v44  ;;  %v1344_v61 = vmul.f32 %v1280_v0, %v4110_v11  ;;  %v1281_v6 = vmul.f32 %v4117_v52, %v4117_v52 }
 0x2ba   : > { %2836 = vtanh.f32 %v1528_v33  ;;  %v1533_v54 = vmul.f32 0.7978846, %v1469_v50  ;;  %v4125_v26 = vadd.f32 %v1137_v42, %v4054_v59  ;;  %v1139_v5 = vpop.f32.mrf.mxu0 }
 0x2bb   : > { %v1534_v7 = vmul.f32 0.7978846, %v1470_v4  ;;  %v1471_v20 = vadd.f32 %v1407_v18, %v4102_v9  ;;  %v1408_v24 = vmul.f32 0.044715, %v1344_v61  ;;  %v1345_v57 = vmul.f32 %v1281_v6, %v4117_v52 }
 0x2bc   : > { %2838 = vtanh.f32 %v1530_v49  ;;  %v1282_v12 = vmul.f32 %v4125_v26, %v4125_v26  ;;  %v4132_v46 = vadd.f32 %v1139_v5, %v4056_v19  ;;  %v1143_v14 = vpop.f32.mrf.mxu0 }
 0x2bd   : > { %2840 = vtanh.f32 %v1532_v8  ;;  %v1535_v16 = vmul.f32 0.7978846, %v1471_v20  ;;  %v1472_v31 = vadd.f32 %v1408_v24, %v4110_v11  ;;  %v1409_v60 = vmul.f32 0.044715, %v1345_v57 }
 0x2be   : > { %2842 = vtanh.f32 %v1533_v54  ;;  %v1346_v15 = vmul.f32 %v1282_v12, %v4125_v26  ;;  %v1283_v21 = vmul.f32 %v4132_v46, %v4132_v46  ;;  %v4139_v22 = vadd.f32 %v1143_v14, %v4054_v59  ;;  %v1145_v32 = vpop.f32.mrf.mxu0 }
 0x2bf   : > { %2844 = vtanh.f32 %v1534_v7  ;;  %v1536_v62 = vmul.f32 0.7978846, %v1472_v31  ;;  %v1473_v63 = vadd.f32 %v1409_v60, %v4117_v52  ;;  %v4143_v35 = vadd.f32 %v1145_v32, %v4056_v19 }
 0x2c0   : > { %2846 = vtanh.f32 %v1535_v16  ;;  %v1410_v37 = vmul.f32 0.044715, %v1346_v15  ;;  %v1347_v10 = vmul.f32 %v1283_v21, %v4132_v46  ;;  %v1284_v43 = vmul.f32 %v4139_v22, %v4139_v22  ;;  %v1147_v36 = vpop.f32.mrf.mxu0 }
 0x2c1   : > { %v2833_v27 = vpop.eup %2832  ;;  %2848 = vtanh.f32 %v1536_v62  ;;  %v1537_v29 = vmul.f32 0.7978846, %v1473_v63  ;;  %v1285_v45 = vmul.f32 %v4143_v35, %v4143_v35  ;;  %v4151_v39 = vadd.f32 %v1147_v36, %v4054_v59 }
 0x2c2   : > { %v1474_v53 = vadd.f32 %v1410_v37, %v4125_v26  ;;  %v1411_v55 = vmul.f32 0.044715, %v1347_v10  ;;  %v1348_v17 = vmul.f32 %v1284_v43, %v4139_v22  ;;  %v1149_v56 = vpop.f32.mrf.mxu0  ;;  %v1657_v48 = vadd.f32 1.0, %v2833_v27 }
 0x2c3   : > { %2850 = vtanh.f32 %v1537_v29  ;;  %v1349_v58 = vmul.f32 %v1285_v45, %v4143_v35  ;;  %v1286_v38 = vmul.f32 %v4151_v39, %v4151_v39  ;;  %v4159_v34 = vadd.f32 %v1149_v56, %v4056_v19 }
 0x2c4   : > { %v1538_v33 = vmul.f32 0.7978846, %v1474_v53  ;;  %v1475_v1 = vadd.f32 %v1411_v55, %v4132_v46  ;;  %v1412_v3 = vmul.f32 0.044715, %v1348_v17  ;;  %v1153_v40 = vpop.f32.mrf.mxu0  ;;  %v1721_v13 = vmul.f32 0.5, %v1657_v48 }
 0x2c5   : > { %v2835_v47 = vpop.eup %2834  ;;  %v1413_v44 = vmul.f32 0.044715, %v1349_v58  ;;  %v1350_v0 = vmul.f32 %v1286_v38, %v4151_v39  ;;  %v1287_v49 = vmul.f32 %v4159_v34, %v4159_v34  ;;  %v4166_v8 = vadd.f32 %v1153_v40, %v4054_v59 }
 0x2c6   : > { %2852 = vtanh.f32 %v1538_v33  ;;  %v1539_v50 = vmul.f32 0.7978846, %v1475_v1  ;;  %v1476_v42 = vadd.f32 %v1412_v3, %v4139_v22  ;;  %v1155_v4 = vpop.f32.mrf.mxu0  ;;  %v1659_v18 = vadd.f32 1.0, %v2835_v47 }
 0x2c7   : > { %v2837_v61 = vpop.eup %2836  ;;  %v1477_v6 = vadd.f32 %v1413_v44, %v4143_v35  ;;  %v1414_v54 = vmul.f32 0.044715, %v1350_v0  ;;  %v1351_v5 = vmul.f32 %v1287_v49, %v4159_v34  ;;  %v1288_v7 = vmul.f32 %v4166_v8, %v4166_v8 }
 0x2c8   : > { %2854 = vtanh.f32 %v1539_v50  ;;  %v1540_v20 = vmul.f32 0.7978846, %v1476_v42  ;;  %v4174_v24 = vadd.f32 %v1155_v4, %v4056_v19  ;;  %v1157_v57 = vpop.f32.mrf.mxu0  ;;  %v1723_v12 = vmul.f32 0.5, %v1659_v18 }
 0x2c9   : > { %v2839_v14 = vpop.eup %2838  ;;  %v1541_v16 = vmul.f32 0.7978846, %v1477_v6  ;;  %v1478_v31 = vadd.f32 %v1414_v54, %v4151_v39  ;;  %v1415_v60 = vmul.f32 0.044715, %v1351_v5  ;;  %v1352_v15 = vmul.f32 %v1288_v7, %v4166_v8 }
 0x2ca   : > { %v4178_v21 = vpop.eup %2840  ;;  %2856 = vtanh.f32 %v1540_v20  ;;  %v1289_v32 = vmul.f32 %v4174_v24, %v4174_v24  ;;  %v4183_v62 = vadd.f32 %v1157_v57, %v4054_v59  ;;  %v1159_v63 = vpop.f32.mrf.mxu0  ;;  %v1656_v37 = vadd.f32 1.0, %v2837_v61 }
 0x2cb   : > { %v4185_v10 = vpop.eup %2842  ;;  %v1542_v43 = vmul.f32 0.7978846, %v1478_v31  ;;  %v1479_v36 = vadd.f32 %v1415_v60, %v4159_v34  ;;  %v1416_v27 = vmul.f32 0.044715, %v1352_v15  ;;  %v1785_v29 = vmul.f32 %v1721_v13, %v4064_v25 }
 0x2cc   : > { %v4189_v45 = vpop.eup %2844  ;;  %v1353_v53 = vmul.f32 %v1289_v32, %v4174_v24  ;;  %v1290_v55 = vmul.f32 %v4183_v62, %v4183_v62  ;;  %v4195_v17 = vadd.f32 %v1159_v63, %v4056_v19  ;;  %v1163_v56 = vpop.f32.mrf.mxu0  ;;  %v1787_v48 = vmul.f32 %v1723_v12, %v4076_v28 }
 0x2cd   : > { %v2847_v58 = vpop.eup %2846  ;;  %2858 = vtanh.f32 %v1541_v16  ;;  %v1543_v38 = vmul.f32 0.7978846, %v1479_v36  ;;  %v1480_v33 = vadd.f32 %v1416_v27, %v4166_v8  ;;  %v4200_v25 = vadd.f32 %v1163_v56, %v4054_v59 }
 0x2ce   : > { %v4202_v1 = vpop.eup %2848  ;;  %v1417_v3 = vmul.f32 0.044715, %v1353_v53  ;;  %v1354_v40 = vmul.f32 %v1290_v55, %v4183_v62  ;;  %v1291_v13 = vmul.f32 %v4195_v17, %v4195_v17  ;;  %v1849_v47 = vpack.c.bf16 %v1787_v48, %v1785_v29  ;;  %v1165_v44 = vpop.f32.mrf.mxu0 }
 0x2cf   : > { %2860 = vtanh.f32 %v1542_v43  ;;  %v1292_v28 = vmul.f32 %v4200_v25, %v4200_v25  ;;  %v4210_v0 = vadd.f32 %v1165_v44, %v4056_v19  ;;  %v1658_v18 = vadd.f32 1.0, %v2839_v14 }
 0x2d0   : > { %v4212_v49 = vpop.eup %2850  ;;  %v1481_v50 = vadd.f32 %v1417_v3, %v4174_v24  ;;  %v1418_v42 = vmul.f32 0.044715, %v1354_v40  ;;  %v1355_v4 = vmul.f32 %v1291_v13, %v4195_v17  ;;  %2046 = vmatprep.mubr.bf16.mxu1 %v1849_v47  ;;  %v1167_v61 = vpop.f32.mrf.mxu0  ;;  %2862 = vtanh.f32 %v1543_v38 }
 0x2d1   : > { %v1356_v6 = vmul.f32 %v1292_v28, %v4200_v25  ;;  %v1293_v54 = vmul.f32 %v4210_v0, %v4210_v0  ;;  %v1720_v5 = vmul.f32 0.5, %v1656_v37  ;;  %v1544_v7 = vmul.f32 0.7978846, %v1480_v33 }
 0x2d2   : > { %v1482_v20 = vadd.f32 %v1418_v42, %v4183_v62  ;;  %v1419_v57 = vmul.f32 0.044715, %v1355_v4  ;;  %v1722_v12 = vmul.f32 0.5, %v1658_v18  ;;  %v1169_v16 = vpop.f32.mrf.mxu0  ;;  %v1545_v60 = vmul.f32 0.7978846, %v1481_v50 }
 0x2d3   : > { %v4220_v31 = vpop.eup %2852  ;;  %v1420_v15 = vmul.f32 0.044715, %v1356_v6  ;;  %v1357_v14 = vmul.f32 %v1293_v54, %v4210_v0  ;;  %v4224_v32 = vadd.f32 %v1167_v61, %v4054_v59  ;;  %v1784_v37 = vmul.f32 %v1720_v5, %v4059_v23 }
 0x2d4   : > { %v1546_v63 = vmul.f32 0.7978846, %v1482_v20  ;;  %v1483_v43 = vadd.f32 %v1419_v57, %v4195_v17  ;;  %v1786_v36 = vmul.f32 %v1722_v12, %v4069_v41  ;;  %v1173_v27 = vpop.f32.mrf.mxu0  ;;  %v4235_v48 = vadd.f32 %v1169_v16, %v4056_v19 }
 0x2d5   : > { %v4229_v29 = vpop.eup %2854  ;;  %v1484_v53 = vadd.f32 %v1420_v15, %v4200_v25  ;;  %v1421_v55 = vmul.f32 0.044715, %v1357_v14  ;;  %v1294_v56 = vmul.f32 %v4224_v32, %v4224_v32  ;;  %2864 = vtanh.f32 %v1544_v7 }
 0x2d6   : > { %v1547_v38 = vmul.f32 0.7978846, %v1483_v43  ;;  %v1848_v33 = vpack.c.bf16 %v1786_v36, %v1784_v37  ;;  %v4238_v3 = vadd.f32 %v1173_v27, %v4054_v59  ;;  %v1175_v23 = vpop.f32.mrf.mxu0  ;;  %2866 = vtanh.f32 %v1545_v60 }
 0x2d7   : > { %v4240_v41 = vpop.eup %2856  ;;  %v1485_v40 = vadd.f32 %v1421_v55, %v4210_v0  ;;  %v1358_v13 = vmul.f32 %v1294_v56, %v4224_v32  ;;  %v1295_v47 = vmul.f32 %v4235_v48, %v4235_v48  ;;  %2868 = vtanh.f32 %v1546_v63 }
 0x2d8   : > { %2047 = vmatmul.mubr.bf16.vlgmr.msra.gmra.mxu1 %v1848_v33  ;;  %v1296_v44 = vmul.f32 %v4238_v3, %v4238_v3  ;;  %v1661_v28 = vadd.f32 1.0, %v4185_v10  ;;  %v1663_v50 = vadd.f32 1.0, %v2847_v58  ;;  %v1177_v42 = vpop.f32.mrf.mxu0  ;;  %2870 = vtanh.f32 %v1547_v38 }
 0x2d9   : > { %v1548_v4 = vmul.f32 0.7978846, %v1484_v53  ;;  %v1422_v18 = vmul.f32 0.044715, %v1358_v13  ;;  %v1359_v61 = vmul.f32 %v1295_v47, %v4235_v48  ;;  %v4254_v20 = vadd.f32 %v1175_v23, %v4056_v19 }
 0x2da   : > { %v4250_v6 = vpop.eup %2858  ;;  %v1360_v54 = vmul.f32 %v1296_v44, %v4238_v3  ;;  %v1725_v5 = vmul.f32 0.5, %v1661_v28  ;;  %v1727_v7 = vmul.f32 0.5, %v1663_v50  ;;  %v1179_v57 = vpop.f32.mrf.mxu0  ;;  %v1549_v12 = vmul.f32 0.7978846, %v1485_v40 }
 0x2db   : > { %v1486_v10 = vadd.f32 %v1422_v18, %v4224_v32  ;;  %v1423_v58 = vmul.f32 0.044715, %v1359_v61  ;;  %v1660_v16 = vadd.f32 1.0, %v4178_v21  ;;  %v1297_v43 = vmul.f32 %v4254_v20, %v4254_v20 }
 0x2dc   : > { %v4258_v60 = vpop.eup %2860  ;;  %v1424_v15 = vmul.f32 0.044715, %v1360_v54  ;;  %v1789_v14 = vmul.f32 %v1725_v5, %v4089_v51  ;;  %v1791_v63 = vmul.f32 %v1727_v7, %v4102_v9  ;;  %v1183_v37 = vpop.f32.mrf.mxu0  ;;  %2872 = vtanh.f32 %v1548_v4 }
 0x2dd   : > { %v1550_v36 = vmul.f32 0.7978846, %v1486_v10  ;;  %v1662_v27 = vadd.f32 1.0, %v4189_v45  ;;  %v1724_v53 = vmul.f32 0.5, %v1660_v16  ;;  %v4265_v55 = vpop.eup %2862  ;;  %v1487_v21 = vadd.f32 %v1423_v58, %v4235_v48 }
 0x2de   : > { %v1851_v56 = vpack.c.bf16 %v1791_v63, %v1789_v14  ;;  %v1361_v38 = vmul.f32 %v1297_v43, %v4254_v20  ;;  %v4270_v51 = vadd.f32 %v1177_v42, %v4054_v59  ;;  %v1185_v9 = vpop.f32.mrf.mxu0  ;;  %2874 = vtanh.f32 %v1549_v12 }
 0x2df   : > { %v1726_v33 = vmul.f32 0.5, %v1662_v27  ;;  %v1488_v23 = vadd.f32 %v1424_v15, %v4238_v3  ;;  %v4276_v13 = vadd.f32 %v1179_v57, %v4056_v19  ;;  %v1788_v44 = vmul.f32 %v1724_v53, %v4082_v30 }
 0x2e0   : > { %2054 = vmatprep.mubr.bf16.mxu1 %v1851_v56  ;;  %v1425_v40 = vmul.f32 0.044715, %v1361_v38  ;;  %v1298_v45 = vmul.f32 %v4270_v51, %v4270_v51  ;;  %v1187_v47 = vpop.f32.mrf.mxu0  ;;  %v4281_v50 = vadd.f32 %v1183_v37, %v4054_v59  ;;  %v1665_v42 = vadd.f32 1.0, %v4212_v49 }
 0x2e1   : > { %v1790_v28 = vmul.f32 %v1726_v33, %v4092_v2  ;;  %2876 = vtanh.f32 %v1550_v36  ;;  %v1551_v4 = vmul.f32 0.7978846, %v1487_v21  ;;  %v1299_v61 = vmul.f32 %v4276_v13, %v4276_v13 }
 0x2e2   : > { %v1362_v18 = vmul.f32 %v1298_v45, %v4270_v51  ;;  %v1189_v54 = vpop.f32.mrf.mxu0  ;;  %v4287_v5 = vpop.eup %2864  ;;  %v1300_v30 = vmul.f32 %v4281_v50, %v4281_v50  ;;  %v1667_v2 = vadd.f32 1.0, %v4229_v29  ;;  %v1729_v57 = vmul.f32 0.5, %v1665_v42 }
 0x2e3   : > { %v1850_v7 = vpack.c.bf16 %v1790_v28, %v1788_v44  ;;  %v4292_v12 = vpop.eup %2866  ;;  %v1489_v49 = vadd.f32 %v1425_v40, %v4254_v20  ;;  %v1363_v58 = vmul.f32 %v1299_v61, %v4276_v13  ;;  %v4297_v16 = vadd.f32 %v1185_v9, %v4056_v19 }
 0x2e4   : > { %v1426_v10 = vmul.f32 0.044715, %v1362_v18  ;;  %v1193_v15 = vpop.f32.mrf.mxu0  ;;  %v4299_v14 = vpop.eup %2868  ;;  %v1552_v63 = vmul.f32 0.7978846, %v1488_v23  ;;  %v1364_v43 = vmul.f32 %v1300_v30, %v4281_v50  ;;  %v1731_v37 = vmul.f32 0.5, %v1667_v2 }
 0x2e5   : > { %2055 = vmatmul.mubr.bf16.gmra.mxu1 %v1850_v7  ;;  %v1664_v29 = vadd.f32 1.0, %v4202_v1  ;;  %v4303_v36 = vpop.eup %2870  ;;  %v1427_v53 = vmul.f32 0.044715, %v1363_v58  ;;  %v1793_v21 = vmul.f32 %v1729_v57, %v4117_v52  ;;  %v1301_v56 = vmul.f32 %v4297_v16, %v4297_v16 }
 0x2e6   : > { %v1490_v27 = vadd.f32 %v1426_v10, %v4270_v51  ;;  %v1195_v38 = vpop.f32.mrf.mxu0  ;;  %v1428_v9 = vmul.f32 0.044715, %v1364_v43  ;;  %v1795_v33 = vmul.f32 %v1731_v37, %v4132_v46  ;;  %v1666_v23 = vadd.f32 1.0, %v4220_v31 }
 0x2e7   : > { %v1728_v40 = vmul.f32 0.5, %v1664_v29  ;;  %v1553_v45 = vmul.f32 0.7978846, %v1489_v49  ;;  %v1491_v1 = vadd.f32 %v1427_v53, %v4276_v13  ;;  %v1365_v44 = vmul.f32 %v1301_v56, %v4297_v16 }
 0x2e8   : > { %v4314_v28 = vadd.f32 %v1187_v47, %v4054_v59  ;;  %v1197_v42 = vpop.f32.mrf.mxu0  ;;  %2878 = vtanh.f32 %v1551_v4  ;;  %v1492_v52 = vadd.f32 %v1428_v9, %v4281_v50  ;;  %v1853_v18 = vpack.c.bf16 %v1795_v33, %v1793_v21 }
 0x2e9   : > { %v1730_v61 = vmul.f32 0.5, %v1666_v23  ;;  %v4317_v7 = vpop.eup %2872  ;;  %2880 = vtanh.f32 %v1552_v63  ;;  %v1554_v46 = vmul.f32 0.7978846, %v1490_v27  ;;  %v1792_v31 = vmul.f32 %v1728_v40, %v4110_v11 }
 0x2ea   : > { %v1302_v30 = vmul.f32 %v4314_v28, %v4314_v28  ;;  %2062 = vmatprep.mubr.bf16.mxu1 %v1853_v18  ;;  %v1429_v2 = vmul.f32 0.044715, %v1365_v44  ;;  %v4324_v57 = vadd.f32 %v1189_v54, %v4056_v19  ;;  %v4327_v4 = vadd.f32 %v1193_v15, %v4054_v59  ;;  %v1199_v63 = vpop.f32.mrf.mxu0 }
 0x2eb   : > { %v1794_v47 = vmul.f32 %v1730_v61, %v4125_v26  ;;  %v4329_v49 = vpop.eup %2874  ;;  %2882 = vtanh.f32 %v1553_v45  ;;  %v1555_v10 = vmul.f32 0.7978846, %v1491_v1  ;;  %v1669_v11 = vadd.f32 1.0, %v4250_v6 }
 0x2ec   : > { %v1366_v58 = vmul.f32 %v1302_v30, %v4314_v28  ;;  %v1556_v43 = vmul.f32 0.7978846, %v1492_v52  ;;  %v1303_v26 = vmul.f32 %v4324_v57, %v4324_v57  ;;  %v1304_v54 = vmul.f32 %v4327_v4, %v4327_v4  ;;  %v1203_v40 = vpop.f32.mrf.mxu0 }
 0x2ed   : > { %v1852_v37 = vpack.c.bf16 %v1794_v47, %v1792_v31  ;;  %2884 = vtanh.f32 %v1554_v46  ;;  %v1671_v15 = vadd.f32 1.0, %v4265_v55  ;;  %v1733_v29 = vmul.f32 0.5, %v1669_v11 }
 0x2ee   : > { %v4338_v27 = vpop.eup %2876  ;;  %v1493_v53 = vadd.f32 %v1429_v2, %v4297_v16  ;;  %v1367_v6 = vmul.f32 %v1303_v26, %v4324_v57  ;;  %v4343_v21 = vadd.f32 %v1195_v38, %v4056_v19  ;;  %v1668_v56 = vadd.f32 1.0, %v4240_v41 }
 0x2ef   : > { %2063 = vmatmul.mubr.bf16.gmra.mxu1 %v1852_v37  ;;  %2886 = vtanh.f32 %v1555_v10  ;;  %v1430_v9 = vmul.f32 0.044715, %v1366_v58  ;;  %v1368_v33 = vmul.f32 %v1304_v54, %v4327_v4  ;;  %v1735_v23 = vmul.f32 0.5, %v1671_v15 }
 0x2f0   : > { %2888 = vtanh.f32 %v1556_v43  ;;  %v1431_v55 = vmul.f32 0.044715, %v1367_v6  ;;  %v1305_v45 = vmul.f32 %v4343_v21, %v4343_v21  ;;  %v1670_v1 = vadd.f32 1.0, %v4258_v60 }
 0x2f1   : > { %v1797_v44 = vmul.f32 %v1733_v29, %v4143_v35  ;;  %v1799_v38 = vmul.f32 %v1735_v23, %v4159_v34  ;;  %v1732_v52 = vmul.f32 0.5, %v1668_v56  ;;  %v4353_v41 = vadd.f32 %v1197_v42, %v4054_v59  ;;  %v1205_v35 = vpop.f32.mrf.mxu0 }
 0x2f2   : > { %v1557_v18 = vmul.f32 0.7978846, %v1493_v53  ;;  %v1495_v61 = vadd.f32 %v1431_v55, %v4324_v57  ;;  %v1369_v46 = vmul.f32 %v1305_v45, %v4343_v21  ;;  %v1734_v31 = vmul.f32 0.5, %v1670_v1 }
 0x2f3   : > { %v1494_v30 = vadd.f32 %v1430_v9, %v4314_v28  ;;  %v1432_v2 = vmul.f32 0.044715, %v1368_v33  ;;  %v1855_v47 = vpack.c.bf16 %v1799_v38, %v1797_v44  ;;  %v1306_v60 = vmul.f32 %v4353_v41, %v4353_v41  ;;  %v1207_v9 = vpop.f32.mrf.mxu0 }
 0x2f4   : > { %v1559_v10 = vmul.f32 0.7978846, %v1495_v61  ;;  %v1433_v34 = vmul.f32 0.044715, %v1369_v46  ;;  %v1796_v58 = vmul.f32 %v1732_v52, %v4139_v22  ;;  %v1798_v42 = vmul.f32 %v1734_v31, %v4151_v39 }
 0x2f5   : > { %v2879_v11 = vpop.eup %2878  ;;  %2070 = vmatprep.mubr.bf16.mxu1 %v1855_v47  ;;  %v1370_v43 = vmul.f32 %v1306_v60, %v4353_v41  ;;  %v4364_v37 = vadd.f32 %v1199_v63, %v4056_v19  ;;  %v4367_v26 = vadd.f32 %v1203_v40, %v4054_v59  ;;  %v1673_v54 = vadd.f32 1.0, %v4292_v12 }
 0x2f6   : > { %v4370_v15 = vpop.eup %2880  ;;  %2890 = vtanh.f32 %v1557_v18  ;;  %v1497_v29 = vadd.f32 %v1433_v34, %v4343_v21  ;;  %v1854_v22 = vpack.c.bf16 %v1798_v42, %v1796_v58  ;;  %v1675_v39 = vadd.f32 1.0, %v4303_v36 }
 0x2f7   : > { %v1558_v53 = vmul.f32 0.7978846, %v1494_v30  ;;  %v1496_v6 = vadd.f32 %v1432_v2, %v4327_v4  ;;  %v1434_v56 = vmul.f32 0.044715, %v1370_v43  ;;  %v1307_v63 = vmul.f32 %v4364_v37, %v4364_v37  ;;  %v1209_v2 = vpop.f32.mrf.mxu0 }
 0x2f8   : > { %v2883_v33 = vpop.eup %2882  ;;  %2892 = vtanh.f32 %v1559_v10  ;;  %2071 = vmatmul.mubr.bf16.gmra.mxu1 %v1854_v22  ;;  %v1737_v12 = vmul.f32 0.5, %v1673_v54  ;;  %v1739_v23 = vmul.f32 0.5, %v1675_v39  ;;  %v4378_v40 = vadd.f32 %v1205_v35, %v4056_v19 }
 0x2f9   : > { %v1561_v55 = vmul.f32 0.7978846, %v1497_v29  ;;  %v1371_v45 = vmul.f32 %v1307_v63, %v4364_v37  ;;  %v1308_v36 = vmul.f32 %v4367_v26, %v4367_v26  ;;  %v1672_v1 = vadd.f32 1.0, %v4287_v5 }
 0x2fa   : > { %v4384_v44 = vpop.eup %2884  ;;  %v1498_v38 = vadd.f32 %v1434_v56, %v4353_v41  ;;  %v1801_v52 = vmul.f32 %v1737_v12, %v4174_v24  ;;  %v1803_v18 = vmul.f32 %v1739_v23, %v4195_v17  ;;  %v1309_v61 = vmul.f32 %v4378_v40, %v4378_v40 }
 0x2fb   : > { %2894 = vtanh.f32 %v1558_v53  ;;  %v1560_v46 = vmul.f32 0.7978846, %v1496_v6  ;;  %v1435_v31 = vmul.f32 0.044715, %v1371_v45  ;;  %v4392_v30 = vadd.f32 %v1207_v9, %v4054_v59 }
 0x2fc   : > { %v2887_v47 = vpop.eup %2886  ;;  %v1857_v5 = vpack.c.bf16 %v1803_v18, %v1801_v52  ;;  %v1373_v60 = vmul.f32 %v1309_v61, %v4378_v40  ;;  %v1674_v35 = vadd.f32 1.0, %v4299_v14  ;;  %v1736_v10 = vmul.f32 0.5, %v1672_v1 }
 0x2fd   : > { %v4396_v24 = vpop.eup %2888  ;;  %2896 = vtanh.f32 %v1561_v55  ;;  %v1499_v17 = vadd.f32 %v1435_v31, %v4364_v37  ;;  %v1372_v34 = vmul.f32 %v1308_v36, %v4367_v26  ;;  %v1310_v58 = vmul.f32 %v4392_v30, %v4392_v30 }
 0x2fe   : > { %v1562_v42 = vmul.f32 0.7978846, %v1498_v38  ;;  %2078 = vmatprep.mubr.bf16.mxu1 %v1857_v5  ;;  %v1437_v43 = vmul.f32 0.044715, %v1373_v60  ;;  %v1738_v54 = vmul.f32 0.5, %v1674_v35  ;;  %v4403_v29 = vadd.f32 %v1209_v2, %v4056_v19 }
 0x2ff   : > { %v1563_v22 = vmul.f32 0.7978846, %v1499_v17  ;;  %v1800_v14 = vmul.f32 %v1736_v10, %v4166_v8  ;;  %v1374_v39 = vmul.f32 %v1310_v58, %v4392_v30  ;;  %v1677_v53 = vadd.f32 1.0, %v4329_v49 }
 0x300   : > { %v1501_v6 = vadd.f32 %v1437_v43, %v4378_v40  ;;  %v1802_v56 = vmul.f32 %v1738_v54, %v4183_v62  ;;  %v1311_v63 = vmul.f32 %v4403_v29, %v4403_v29  ;;  %v1679_v9 = vadd.f32 1.0, %v2879_v11 }
 0x301   : > { %2898 = vtanh.f32 %v1563_v22  ;;  %v1741_v12 = vmul.f32 0.5, %v1677_v53  ;;  %v1676_v23 = vadd.f32 1.0, %v4317_v7  ;;  %v1436_v55 = vmul.f32 0.044715, %v1372_v34 }
 0x302   : > { %v1856_v45 = vpack.c.bf16 %v1802_v56, %v1800_v14  ;;  %v1438_v36 = vmul.f32 0.044715, %v1374_v39  ;;  %v1375_v8 = vmul.f32 %v1311_v63, %v4403_v29  ;;  %2900 = vtanh.f32 %v1560_v46 }
 0x303   : > { %v2891_v1 = vpop.eup %2890  ;;  %v1565_v49 = vmul.f32 0.7978846, %v1501_v6  ;;  %v1743_v38 = vmul.f32 0.5, %v1679_v9  ;;  %v1678_v52 = vadd.f32 1.0, %v4338_v27  ;;  %2902 = vtanh.f32 %v1562_v42 }
 0x304   : > { %2079 = vmatmul.mubr.bf16.gmra.mxu1 %v1856_v45  ;;  %v1439_v62 = vmul.f32 0.044715, %v1375_v8  ;;  %v1740_v18 = vmul.f32 0.5, %v1676_v23  ;;  %v1681_v11 = vadd.f32 1.0, %v2883_v33  ;;  %v1805_v31 = vmul.f32 %v1741_v12, %v4210_v0 }
 0x305   : > { %v2893_v61 = vpop.eup %2892  ;;  %v1807_v7 = vmul.f32 %v1743_v38, %v4235_v48  ;;  %v1742_v2 = vmul.f32 0.5, %v1678_v52  ;;  %v1683_v5 = vadd.f32 1.0, %v2887_v47  ;;  %v1500_v60 = vadd.f32 %v1436_v55, %v4367_v26 }
 0x306   : > { %v1502_v46 = vadd.f32 %v1438_v36, %v4392_v30  ;;  %v1503_v35 = vadd.f32 %v1439_v62, %v4403_v29  ;;  %v1745_v10 = vmul.f32 0.5, %v1681_v11  ;;  %2904 = vtanh.f32 %v1565_v49 }
 0x307   : > { %v1859_v27 = vpack.c.bf16 %v1807_v7, %v1805_v31  ;;  %v1806_v17 = vmul.f32 %v1742_v2, %v4224_v32  ;;  %v1747_v34 = vmul.f32 0.5, %v1683_v5  ;;  %v1804_v0 = vmul.f32 %v1740_v18, %v4200_v25 }
 0x308   : > { %v2895_v33 = vpop.eup %2894  ;;  %v1567_v58 = vmul.f32 0.7978846, %v1503_v35  ;;  %v1680_v48 = vadd.f32 1.0, %v4370_v15  ;;  %v1682_v47 = vadd.f32 1.0, %v4384_v44  ;;  %v1809_v42 = vmul.f32 %v1745_v10, %v4254_v20 }
 0x309   : > { %2086 = vmatprep.mubr.bf16.mxu1 %v1859_v27  ;;  %v1811_v43 = vmul.f32 %v1747_v34, %v4276_v13  ;;  %v1685_v54 = vadd.f32 1.0, %v2891_v1  ;;  %v1687_v22 = vadd.f32 1.0, %v2893_v61  ;;  %v1566_v39 = vmul.f32 0.7978846, %v1502_v46 }
 0x30a   : > { %v2897_v14 = vpop.eup %2896  ;;  %2906 = vtanh.f32 %v1567_v58  ;;  %v1858_v32 = vpack.c.bf16 %v1806_v17, %v1804_v0  ;;  %v1746_v53 = vmul.f32 0.5, %v1682_v47  ;;  %v1564_v25 = vmul.f32 0.7978846, %v1500_v60 }
 0x30b   : > { %v1861_v6 = vpack.c.bf16 %v1811_v43, %v1809_v42  ;;  %v1749_v56 = vmul.f32 0.5, %v1685_v54  ;;  %v1751_v63 = vmul.f32 0.5, %v1687_v22  ;;  %v1744_v15 = vmul.f32 0.5, %v1680_v48 }
 0x30c   : > { %2087 = vmatmul.mubr.bf16.gmra.mxu1 %v1858_v32  ;;  %2908 = vtanh.f32 %v1566_v39  ;;  %v1810_v20 = vmul.f32 %v1746_v53, %v4270_v51  ;;  %v1686_v13 = vadd.f32 1.0, %v2895_v33  ;;  %v1689_v23 = vadd.f32 1.0, %v2897_v14 }
 0x30d   : > { %2094 = vmatprep.mubr.bf16.mxu1 %v1861_v6  ;;  %v1815_v44 = vmul.f32 %v1751_v63, %v4324_v57  ;;  %v1813_v12 = vmul.f32 %v1749_v56, %v4297_v16  ;;  %2910 = vtanh.f32 %v1564_v25  ;;  %v1808_v36 = vmul.f32 %v1744_v15, %v4238_v3 }
 0x30e   : > { %v2899_v9 = vpop.eup %2898  ;;  %v1684_v8 = vadd.f32 1.0, %v4396_v24  ;;  %v1750_v57 = vmul.f32 0.5, %v1686_v13  ;;  %v1753_v62 = vmul.f32 0.5, %v1689_v23 }
 0x30f   : > { %v1691_v55 = vadd.f32 1.0, %v2899_v9  ;;  %v2901_v45 = vpop.eup %2900  ;;  %v1863_v49 = vpack.c.bf16 %v1815_v44, %v1813_v12  ;;  %v1860_v52 = vpack.c.bf16 %v1810_v20, %v1808_v36 }
 0x310   : > { %v2903_v1 = vpop.eup %2902  ;;  %v1748_v51 = vmul.f32 0.5, %v1684_v8  ;;  %v1814_v11 = vmul.f32 %v1750_v57, %v4314_v28  ;;  %v1817_v3 = vmul.f32 %v1753_v62, %v4343_v21  ;;  %v1688_v2 = vadd.f32 1.0, %v2901_v45 }
 0x311   : > { %v1755_v38 = vmul.f32 0.5, %v1691_v55  ;;  %v1690_v61 = vadd.f32 1.0, %v2903_v1 }
 0x312   : > { %v1812_v24 = vmul.f32 %v1748_v51, %v4281_v50  ;;  %v1752_v34 = vmul.f32 0.5, %v1688_v2 }
 0x313   : > { %v2905_v18 = vpop.eup %2904  ;;  %v1819_v16 = vmul.f32 %v1755_v38, %v4364_v37  ;;  %v1754_v35 = vmul.f32 0.5, %v1690_v61 }
 0x314   : > { %2095 = vmatmul.mubr.bf16.gmra.mxu1 %v1860_v52  ;;  %v1693_v7 = vadd.f32 1.0, %v2905_v18  ;;  %v1862_v46 = vpack.c.bf16 %v1814_v11, %v1812_v24  ;;  %v1816_v50 = vmul.f32 %v1752_v34, %v4327_v4 }
 0x315   : > { %2102 = vmatprep.mubr.bf16.mxu1 %v1863_v49  ;;  %v1865_v60 = vpack.c.bf16 %v1819_v16, %v1817_v3  ;;  %v1818_v33 = vmul.f32 %v1754_v35, %v4353_v41 }
 0x316   : > { %v1757_v17 = vmul.f32 0.5, %v1693_v7 }
 0x317   : > { %v2907_v31 = vpop.eup %2906  ;;  %v1864_v47 = vpack.c.bf16 %v1818_v33, %v1816_v50 }
 0x318   : > { %v1695_v5 = vadd.f32 1.0, %v2907_v31  ;;  %v1821_v58 = vmul.f32 %v1757_v17, %v4378_v40 }
 0x319   : > { %v2909_v27 = vpop.eup %2908 }
 0x31a   : > { %v1759_v10 = vmul.f32 0.5, %v1695_v5  ;;  %v2911_v37 = vpop.eup %2910  ;;  %v1694_v21 = vadd.f32 1.0, %v2909_v27 }
 0x31b   : > { %v1692_v0 = vadd.f32 1.0, %v2911_v37 }
 0x31c   : > { %2103 = vmatmul.mubr.bf16.gmra.mxu1 %v1862_v46  ;;  %v1823_v28 = vmul.f32 %v1759_v10, %v4403_v29  ;;  %v1758_v42 = vmul.f32 0.5, %v1694_v21 }
 0x31d   : > { %2110 = vmatprep.mubr.bf16.mxu1 %v1865_v60  ;;  %v1756_v43 = vmul.f32 0.5, %v1692_v0 }
 0x31e   : > { %v1867_v48 = vpack.c.bf16 %v1823_v28, %v1821_v58  ;;  %v1822_v54 = vmul.f32 %v1758_v42, %v4392_v30 }
 0x31f   : > { %v1820_v22 = vmul.f32 %v1756_v43, %v4367_v26 }
 0x321   : > { %v1866_v14 = vpack.c.bf16 %v1822_v54, %v1820_v22 }
 0x324   : > { %2111 = vmatmul.mubr.bf16.gmra.mxu1 %v1864_v47 }
 0x325   : > { %2118 = vmatprep.mubr.bf16.mxu1 %v1867_v48 }
 0x32c   : > { %2119 = vmatmul.mubr.bf16.gmra.mxu1 %v1866_v14 }
 0x337   : > { %v1213_v29 = vpop.f32.mrf.mxu0 }
 0x338   : > { %v4442_v41 = vadd.f32 %v1213_v29, %v4054_v59 }
 0x339   : > { %v1215_v40 = vpop.f32.mrf.mxu0 }
 0x33a   : > { %v1312_v4 = vmul.f32 %v4442_v41, %v4442_v41  ;;  %v4447_v39 = vadd.f32 %v1215_v40, %v4056_v19 }
 0x33b   : > { %v1217_v32 = vpop.f32.mrf.mxu0 }
 0x33c   : > { %v1376_v53 = vmul.f32 %v1312_v4, %v4442_v41  ;;  %v1313_v30 = vmul.f32 %v4447_v39, %v4447_v39  ;;  %v4453_v26 = vadd.f32 %v1217_v32, %v4054_v59 }
 0x33d   : > { %v1219_v6 = vpop.f32.mrf.mxu0 }
 0x33e   : > { %v1377_v56 = vmul.f32 %v1313_v30, %v4447_v39  ;;  %v1314_v63 = vmul.f32 %v4453_v26, %v4453_v26  ;;  %v4459_v25 = vadd.f32 %v1219_v6, %v4056_v19  ;;  %v1440_v15 = vmul.f32 0.044715, %v1376_v53 }
 0x33f   : > { %v1223_v44 = vpop.f32.mrf.mxu0 }
 0x340   : > { %v1441_v9 = vmul.f32 0.044715, %v1377_v56  ;;  %v1378_v20 = vmul.f32 %v1314_v63, %v4453_v26  ;;  %v1315_v13 = vmul.f32 %v4459_v25, %v4459_v25  ;;  %v4465_v12 = vadd.f32 %v1223_v44, %v4054_v59 }
 0x341   : > { %v1225_v23 = vpop.f32.mrf.mxu0  ;;  %v1504_v8 = vadd.f32 %v1440_v15, %v4442_v41 }
 0x342   : > { %v1505_v55 = vadd.f32 %v1441_v9, %v4447_v39  ;;  %v1442_v45 = vmul.f32 0.044715, %v1378_v20  ;;  %v1379_v36 = vmul.f32 %v1315_v13, %v4459_v25  ;;  %v1316_v1 = vmul.f32 %v4465_v12, %v4465_v12 }
 0x343   : > { %v4473_v49 = vadd.f32 %v1225_v23, %v4056_v19  ;;  %v1227_v38 = vpop.f32.mrf.mxu0  ;;  %v1568_v3 = vmul.f32 0.7978846, %v1504_v8 }
 0x344   : > { %v1569_v52 = vmul.f32 0.7978846, %v1505_v55  ;;  %v1443_v57 = vmul.f32 0.044715, %v1379_v36  ;;  %v1506_v62 = vadd.f32 %v1442_v45, %v4453_v26  ;;  %v1380_v18 = vmul.f32 %v1316_v1, %v4465_v12 }
 0x345   : > { %v1317_v51 = vmul.f32 %v4473_v49, %v4473_v49  ;;  %v4480_v16 = vadd.f32 %v1227_v38, %v4054_v59  ;;  %v1229_v11 = vpop.f32.mrf.mxu0 }
 0x346   : > { %2912 = vtanh.f32 %v1569_v52  ;;  %v1507_v61 = vadd.f32 %v1443_v57, %v4459_v25  ;;  %v4484_v31 = vadd.f32 %v1229_v11, %v4056_v19  ;;  %v1444_v7 = vmul.f32 0.044715, %v1380_v18 }
 0x347   : > { %v1381_v24 = vmul.f32 %v1317_v51, %v4473_v49  ;;  %v1318_v2 = vmul.f32 %v4480_v16, %v4480_v16  ;;  %v1233_v5 = vpop.f32.mrf.mxu0  ;;  %v1570_v10 = vmul.f32 0.7978846, %v1506_v62 }
 0x348   : > { %v1571_v60 = vmul.f32 0.7978846, %v1507_v61  ;;  %v1319_v46 = vmul.f32 %v4484_v31, %v4484_v31  ;;  %v4492_v35 = vadd.f32 %v1233_v5, %v4054_v59  ;;  %v1508_v27 = vadd.f32 %v1444_v7, %v4465_v12 }
 0x349   : > { %v1445_v17 = vmul.f32 0.044715, %v1381_v24  ;;  %v1382_v34 = vmul.f32 %v1318_v2, %v4480_v16  ;;  %v1235_v37 = vpop.f32.mrf.mxu0 }
 0x34a   : > { %2914 = vtanh.f32 %v1571_v60  ;;  %v1383_v28 = vmul.f32 %v1319_v46, %v4484_v31  ;;  %v1320_v33 = vmul.f32 %v4492_v35, %v4492_v35  ;;  %v4500_v21 = vadd.f32 %v1235_v37, %v4056_v19 }
 0x34b   : > { %2916 = vtanh.f32 %v1568_v3  ;;  %v1572_v58 = vmul.f32 0.7978846, %v1508_v27  ;;  %v1509_v50 = vadd.f32 %v1445_v17, %v4473_v49  ;;  %v1446_v0 = vmul.f32 0.044715, %v1382_v34  ;;  %v1237_v48 = vpop.f32.mrf.mxu0 }
 0x34c   : > { %v1447_v47 = vmul.f32 0.044715, %v1383_v28  ;;  %v1384_v42 = vmul.f32 %v1320_v33, %v4492_v35  ;;  %v1321_v43 = vmul.f32 %v4500_v21, %v4500_v21  ;;  %v4507_v54 = vadd.f32 %v1237_v48, %v4054_v59 }
 0x34d   : > { %2918 = vtanh.f32 %v1570_v10  ;;  %v1573_v22 = vmul.f32 0.7978846, %v1509_v50  ;;  %v1510_v14 = vadd.f32 %v1446_v0, %v4480_v16  ;;  %v1239_v29 = vpop.f32.mrf.mxu0 }
 0x34e   : > { %v1511_v40 = vadd.f32 %v1447_v47, %v4484_v31  ;;  %v1448_v4 = vmul.f32 0.044715, %v1384_v42  ;;  %v1385_v32 = vmul.f32 %v1321_v43, %v4500_v21  ;;  %v1322_v53 = vmul.f32 %v4507_v54, %v4507_v54 }
 0x34f   : > { %2920 = vtanh.f32 %v1572_v58  ;;  %v1574_v30 = vmul.f32 0.7978846, %v1510_v14  ;;  %v4515_v6 = vadd.f32 %v1239_v29, %v4056_v19  ;;  %v1243_v56 = vpop.f32.mrf.mxu0 }
 0x350   : > { %v1575_v63 = vmul.f32 0.7978846, %v1511_v40  ;;  %v1512_v15 = vadd.f32 %v1448_v4, %v4492_v35  ;;  %v1449_v44 = vmul.f32 0.044715, %v1385_v32  ;;  %v1386_v9 = vmul.f32 %v1322_v53, %v4507_v54 }
 0x351   : > { %2922 = vtanh.f32 %v1573_v22  ;;  %v1323_v20 = vmul.f32 %v4515_v6, %v4515_v6  ;;  %v4522_v13 = vadd.f32 %v1243_v56, %v4054_v59  ;;  %v1245_v23 = vpop.f32.mrf.mxu0 }
 0x352   : > { %2924 = vtanh.f32 %v1574_v30  ;;  %v1576_v55 = vmul.f32 0.7978846, %v1512_v15  ;;  %v1513_v45 = vadd.f32 %v1449_v44, %v4500_v21  ;;  %v1450_v36 = vmul.f32 0.044715, %v1386_v9 }
 0x353   : > { %v2913_v8 = vpop.eup %2912  ;;  %2926 = vtanh.f32 %v1575_v63  ;;  %v1387_v1 = vmul.f32 %v1323_v20, %v4515_v6  ;;  %v1324_v38 = vmul.f32 %v4522_v13, %v4522_v13  ;;  %v4529_v52 = vadd.f32 %v1245_v23, %v4056_v19  ;;  %v1247_v57 = vpop.f32.mrf.mxu0 }
 0x354   : > { %2928 = vtanh.f32 %v1576_v55  ;;  %v1577_v62 = vmul.f32 0.7978846, %v1513_v45  ;;  %v1514_v18 = vadd.f32 %v1450_v36, %v4507_v54  ;;  %v4533_v51 = vadd.f32 %v1247_v57, %v4054_v59 }
 0x355   : > { %v1451_v11 = vmul.f32 0.044715, %v1387_v1  ;;  %v1388_v61 = vmul.f32 %v1324_v38, %v4522_v13  ;;  %v1325_v3 = vmul.f32 %v4529_v52, %v4529_v52  ;;  %v1249_v7 = vpop.f32.mrf.mxu0  ;;  %v1697_v24 = vadd.f32 1.0, %v2913_v8 }
 0x356   : > { %2930 = vtanh.f32 %v1577_v62  ;;  %v1578_v2 = vmul.f32 0.7978846, %v1514_v18  ;;  %v1326_v5 = vmul.f32 %v4533_v51, %v4533_v51  ;;  %v4541_v60 = vadd.f32 %v1249_v7, %v4056_v19 }
 0x357   : > { %v2915_v46 = vpop.eup %2914  ;;  %v1515_v10 = vadd.f32 %v1451_v11, %v4515_v6  ;;  %v1452_v27 = vmul.f32 0.044715, %v1388_v61  ;;  %v1389_v17 = vmul.f32 %v1325_v3, %v4529_v52  ;;  %v1253_v34 = vpop.f32.mrf.mxu0  ;;  %v1761_v37 = vmul.f32 0.5, %v1697_v24 }
 0x358   : > { %v2917_v28 = vpop.eup %2916  ;;  %2932 = vtanh.f32 %v1578_v2  ;;  %v1390_v33 = vmul.f32 %v1326_v5, %v4533_v51  ;;  %v1327_v58 = vmul.f32 %v4541_v60, %v4541_v60  ;;  %v4549_v50 = vadd.f32 %v1253_v34, %v4054_v59 }
 0x359   : > { %v1579_v0 = vmul.f32 0.7978846, %v1515_v10  ;;  %v1516_v48 = vadd.f32 %v1452_v27, %v4522_v13  ;;  %v1453_v47 = vmul.f32 0.044715, %v1389_v17  ;;  %v1255_v42 = vpop.f32.mrf.mxu0  ;;  %v1699_v43 = vadd.f32 1.0, %v2915_v46 }
 0x35a   : > { %v2919_v22 = vpop.eup %2918  ;;  %v1454_v14 = vmul.f32 0.044715, %v1390_v33  ;;  %v1391_v29 = vmul.f32 %v1327_v58, %v4541_v60  ;;  %v1328_v40 = vmul.f32 %v4549_v50, %v4549_v50  ;;  %v4556_v4 = vadd.f32 %v1255_v42, %v4056_v19 }
 0x35b   : > { %2934 = vtanh.f32 %v1579_v0  ;;  %v1580_v32 = vmul.f32 0.7978846, %v1516_v48  ;;  %v1517_v53 = vadd.f32 %v1453_v47, %v4529_v52  ;;  %v1257_v30 = vpop.f32.mrf.mxu0  ;;  %v1763_v56 = vmul.f32 0.5, %v1699_v43 }
 0x35c   : > { %v4559_v63 = vpop.eup %2920  ;;  %v1518_v15 = vadd.f32 %v1454_v14, %v4533_v51  ;;  %v1455_v44 = vmul.f32 0.044715, %v1391_v29  ;;  %v1392_v9 = vmul.f32 %v1328_v40, %v4549_v50  ;;  %v1329_v20 = vmul.f32 %v4556_v4, %v4556_v4 }
 0x35d   : > { %2936 = vtanh.f32 %v1580_v32  ;;  %v1581_v23 = vmul.f32 0.7978846, %v1517_v53  ;;  %v4566_v55 = vadd.f32 %v1257_v30, %v4054_v59  ;;  %v1259_v45 = vpop.f32.mrf.mxu0  ;;  %v1696_v36 = vadd.f32 1.0, %v2917_v28 }
 0x35e   : > { %v2923_v8 = vpop.eup %2922  ;;  %v1582_v1 = vmul.f32 0.7978846, %v1518_v15  ;;  %v1519_v38 = vadd.f32 %v1455_v44, %v4541_v60  ;;  %v1456_v57 = vmul.f32 0.044715, %v1392_v9  ;;  %v1393_v62 = vmul.f32 %v1329_v20, %v4556_v4 }
 0x35f   : > { %v4570_v18 = vpop.eup %2924  ;;  %v1330_v11 = vmul.f32 %v4566_v55, %v4566_v55  ;;  %v4575_v61 = vadd.f32 %v1259_v45, %v4056_v19  ;;  %v1263_v3 = vpop.f32.mrf.mxu0  ;;  %v1825_v7 = vmul.f32 %v1761_v37, %v4447_v39  ;;  %v1827_v24 = vmul.f32 %v1763_v56, %v4459_v25 }
 0x360   : > { %v2927_v2 = vpop.eup %2926  ;;  %2938 = vtanh.f32 %v1581_v23  ;;  %v1583_v5 = vmul.f32 0.7978846, %v1519_v38  ;;  %v1520_v46 = vadd.f32 %v1456_v57, %v4549_v50  ;;  %v1457_v10 = vmul.f32 0.044715, %v1393_v62 }
 0x361   : > { %v4580_v27 = vpop.eup %2928  ;;  %v1394_v17 = vmul.f32 %v1330_v11, %v4566_v55  ;;  %v1331_v34 = vmul.f32 %v4575_v61, %v4575_v61  ;;  %v4586_v28 = vadd.f32 %v1263_v3, %v4054_v59  ;;  %v1869_v33 = vpack.c.bf16 %v1827_v24, %v1825_v7  ;;  %v1265_v39 = vpop.f32.mrf.mxu0 }
 0x362   : > { %2940 = vtanh.f32 %v1582_v1  ;;  %v1584_v25 = vmul.f32 0.7978846, %v1520_v46  ;;  %v1521_v37 = vadd.f32 %v1457_v10, %v4556_v4  ;;  %v4590_v58 = vadd.f32 %v1265_v39, %v4056_v19 }
 0x363   : > { %v2931_v0 = vpop.eup %2930  ;;  %v1458_v48 = vmul.f32 0.044715, %v1394_v17  ;;  %v1395_v47 = vmul.f32 %v1331_v34, %v4575_v61  ;;  %v1332_v42 = vmul.f32 %v4586_v28, %v4586_v28  ;;  %2126 = vmatprep.mubr.bf16.mxu1 %v1869_v33  ;;  %v1698_v43 = vadd.f32 1.0, %v2919_v22  ;;  %v1267_v14 = vpop.f32.mrf.mxu0 }
 0x364   : > { %2942 = vtanh.f32 %v1583_v5  ;;  %v1585_v29 = vmul.f32 0.7978846, %v1521_v37  ;;  %v1333_v40 = vmul.f32 %v4590_v58, %v4590_v58  ;;  %v1760_v32 = vmul.f32 0.5, %v1696_v36 }
 0x365   : > { %v2933_v53 = vpop.eup %2932  ;;  %v1522_v30 = vadd.f32 %v1458_v48, %v4566_v55  ;;  %v1459_v56 = vmul.f32 0.044715, %v1395_v47  ;;  %v1396_v15 = vmul.f32 %v1332_v42, %v4586_v28  ;;  %v1762_v44 = vmul.f32 0.5, %v1698_v43  ;;  %v1269_v9 = vpop.f32.mrf.mxu0 }
 0x366   : > { %2944 = vtanh.f32 %v1584_v25  ;;  %v1397_v20 = vmul.f32 %v1333_v40, %v4590_v58  ;;  %v4601_v22 = vadd.f32 %v1267_v14, %v4054_v59  ;;  %v1824_v45 = vmul.f32 %v1760_v32, %v4442_v41 }
 0x367   : > { %2946 = vtanh.f32 %v1585_v29  ;;  %v1523_v23 = vadd.f32 %v1459_v56, %v4575_v61  ;;  %v1826_v36 = vmul.f32 %v1762_v44, %v4453_v26  ;;  %v4609_v62 = vadd.f32 %v1269_v9, %v4056_v19 }
 0x368   : > { %v2935_v1 = vpop.eup %2934  ;;  %v1461_v38 = vmul.f32 0.044715, %v1397_v20  ;;  %v1334_v57 = vmul.f32 %v4601_v22, %v4601_v22  ;;  %v1701_v11 = vadd.f32 1.0, %v2923_v8  ;;  %v1586_v3 = vmul.f32 0.7978846, %v1522_v30 }
 0x369   : > { %v1587_v7 = vmul.f32 0.7978846, %v1523_v23  ;;  %v1460_v59 = vmul.f32 0.044715, %v1396_v15  ;;  %v1868_v24 = vpack.c.bf16 %v1826_v36, %v1824_v45  ;;  %v1335_v26 = vmul.f32 %v4609_v62, %v4609_v62 }
 0x36a   : > { %v4611_v5 = vpop.eup %2936  ;;  %v1525_v46 = vadd.f32 %v1461_v38, %v4590_v58  ;;  %v1398_v41 = vmul.f32 %v1334_v57, %v4601_v22  ;;  %v1703_v10 = vadd.f32 1.0, %v2927_v2  ;;  %v1765_v17 = vmul.f32 0.5, %v1701_v11 }
 0x36b   : > { %2948 = vtanh.f32 %v1587_v7  ;;  %2127 = vmatmul.mubr.bf16.gmra.mxu1 %v1868_v24  ;;  %v1700_v19 = vadd.f32 1.0, %v4559_v63  ;;  %v1399_v33 = vmul.f32 %v1335_v26, %v4609_v62  ;;  %v1524_v37 = vadd.f32 %v1460_v59, %v4586_v28 }
 0x36c   : > { %v1589_v8 = vmul.f32 0.7978846, %v1525_v46  ;;  %v1462_v34 = vmul.f32 0.044715, %v1398_v41  ;;  %v1767_v39 = vmul.f32 0.5, %v1703_v10  ;;  %2950 = vtanh.f32 %v1586_v3 }
 0x36d   : > { %v2939_v25 = vpop.eup %2938  ;;  %v1702_v48 = vadd.f32 1.0, %v4570_v18  ;;  %v1764_v47 = vmul.f32 0.5, %v1700_v19  ;;  %v1463_v2 = vmul.f32 0.044715, %v1399_v33  ;;  %v1829_v43 = vmul.f32 %v1765_v17, %v4473_v49 }
 0x36e   : > { %v1526_v42 = vadd.f32 %v1462_v34, %v4601_v22  ;;  %v1831_v14 = vmul.f32 %v1767_v39, %v4484_v31  ;;  %2952 = vtanh.f32 %v1589_v8  ;;  %v1705_v40 = vadd.f32 1.0, %v2931_v0 }
 0x36f   : > { %v2941_v63 = vpop.eup %2940  ;;  %v1766_v29 = vmul.f32 0.5, %v1702_v48  ;;  %v1707_v32 = vadd.f32 1.0, %v2935_v1  ;;  %v1527_v30 = vadd.f32 %v1463_v2, %v4609_v62  ;;  %v1828_v15 = vmul.f32 %v1764_v47, %v4465_v12 }
 0x370   : > { %v1871_v56 = vpack.c.bf16 %v1831_v14, %v1829_v43  ;;  %v1704_v18 = vadd.f32 1.0, %v4580_v27  ;;  %v1769_v20 = vmul.f32 0.5, %v1705_v40  ;;  %v1706_v49 = vadd.f32 1.0, %v2933_v53 }
 0x371   : > { %v2943_v44 = vpop.eup %2942  ;;  %v1830_v9 = vmul.f32 %v1766_v29, %v4480_v16  ;;  %v1771_v23 = vmul.f32 0.5, %v1707_v32  ;;  %v1590_v45 = vmul.f32 0.7978846, %v1526_v42  ;;  %v1591_v31 = vmul.f32 0.7978846, %v1527_v30 }
 0x372   : > { %2134 = vmatprep.mubr.bf16.mxu1 %v1871_v56  ;;  %v1709_v36 = vadd.f32 1.0, %v2939_v25  ;;  %v1833_v1 = vmul.f32 %v1769_v20, %v4500_v21  ;;  %v1770_v11 = vmul.f32 0.5, %v1706_v49  ;;  %v1711_v27 = vadd.f32 1.0, %v2943_v44 }
 0x373   : > { %v2945_v38 = vpop.eup %2944  ;;  %v1870_v0 = vpack.c.bf16 %v1830_v9, %v1828_v15  ;;  %v1835_v57 = vmul.f32 %v1771_v23, %v4515_v6  ;;  %2954 = vtanh.f32 %v1591_v31  ;;  %v1588_v7 = vmul.f32 0.7978846, %v1524_v37 }
 0x374   : > { %v2947_v12 = vpop.eup %2946  ;;  %v1773_v3 = vmul.f32 0.5, %v1709_v36  ;;  %v1768_v59 = vmul.f32 0.5, %v1704_v18  ;;  %v1775_v53 = vmul.f32 0.5, %v1711_v27  ;;  %2956 = vtanh.f32 %v1590_v45  ;;  %v2961_v27 = vld [vmem:[%s3565_s21 + $0x8] sm:$0xff] }
 0x375   : > { %2135 = vmatmul.mubr.bf16.gmra.mxu1 %v1870_v0  ;;  %v1873_v16 = vpack.c.bf16 %v1835_v57, %v1833_v1  ;;  %v1834_v24 = vmul.f32 %v1770_v11, %v4507_v54  ;;  %v1710_v46 = vadd.f32 1.0, %v2941_v63  ;;  %v1713_v26 = vadd.f32 1.0, %v2947_v12  ;;  %v2960_v57 = vld [vmem:[%s3565_s21] sm:$0xff] }
 0x376   : > { %v1837_v21 = vmul.f32 %v1773_v3, %v4529_v52  ;;  %v1839_v6 = vmul.f32 %v1775_v53, %v4541_v60  ;;  %2958 = vtanh.f32 %v1588_v7  ;;  %v1832_v10 = vmul.f32 %v1768_v59, %v4492_v35 }
 0x377   : > { %2142 = vmatprep.mubr.bf16.mxu1 %v1873_v16  ;;  %v1708_v17 = vadd.f32 1.0, %v4611_v5  ;;  %v1774_v39 = vmul.f32 0.5, %v1710_v46  ;;  %v1777_v54 = vmul.f32 0.5, %v1713_v26  ;;  %v1712_v43 = vadd.f32 1.0, %v2945_v38 }
 0x378   : > { %v2949_v41 = vpop.eup %2948  ;;  %v1875_v34 = vpack.c.bf16 %v1839_v6, %v1837_v21  ;;  %v1872_v33 = vpack.c.bf16 %v1834_v24, %v1832_v10 }
 0x379   : > { %v1715_v19 = vadd.f32 1.0, %v2949_v41  ;;  %v2951_v8 = vpop.eup %2950  ;;  %v1772_v48 = vmul.f32 0.5, %v1708_v17  ;;  %v1838_v60 = vmul.f32 %v1774_v39, %v4533_v51  ;;  %v1841_v35 = vmul.f32 %v1777_v54, %v4556_v4  ;;  %v2962_v41 = vld [vmem:[%s3565_s21 + $0x10] sm:$0xff]  ;;  %v2963_v17 = vld [vmem:[%s3565_s21 + $0x18] sm:$0xff] }
 0x37a   : > { %v1714_v47 = vadd.f32 1.0, %v2951_v8  ;;  %v1776_v15 = vmul.f32 0.5, %v1712_v43 }
 0x37b   : > { %v1779_v25 = vmul.f32 0.5, %v1715_v19  ;;  %v2953_v37 = vpop.eup %2952  ;;  %v1836_v2 = vmul.f32 %v1772_v48, %v4522_v13 }
 0x37c   : > { %v1717_v42 = vadd.f32 1.0, %v2953_v37  ;;  %v1778_v40 = vmul.f32 0.5, %v1714_v47  ;;  %v1840_v44 = vmul.f32 %v1776_v15, %v4549_v50  ;;  %v2964_v37 = vld [vmem:[%s3565_s21 + $0x20] sm:$0xff]  ;;  %v2965_v47 = vld [vmem:[%s3565_s21 + $0x28] sm:$0xff] }
 0x37d   : > { %2143 = vmatmul.mubr.bf16.gmra.mxu1 %v1872_v33  ;;  %v1843_v52 = vmul.f32 %v1779_v25, %v4575_v61  ;;  %v1874_v29 = vpack.c.bf16 %v1838_v60, %v1836_v2 }
 0x37e   : > { %2150 = vmatprep.mubr.bf16.mxu1 %v1875_v34  ;;  %v1781_v30 = vmul.f32 0.5, %v1717_v42  ;;  %v1842_v4 = vmul.f32 %v1778_v40, %v4566_v55 }
 0x37f   : > { %v1877_v14 = vpack.c.bf16 %v1843_v52, %v1841_v35 }
 0x380   : > { %v2955_v5 = vpop.eup %2954  ;;  %v1845_v13 = vmul.f32 %v1781_v30, %v4590_v58  ;;  %v1876_v23 = vpack.c.bf16 %v1842_v4, %v1840_v44  ;;  %v4649_v58 = vld [vmem:[%s525_s17] ss:$0 sm:$0xff]  ;;  %v2967_v30 = vld [vmem:[%s3565_s21 + $0x38] sm:$0xff]  ;;  %v2968_v44 = vld [vmem:[%s3565_s21 + $0x40] sm:$0xff] }
 0x381   : > { %v1719_v63 = vadd.f32 1.0, %v2955_v5  ;;  %v2957_v32 = vpop.eup %2956 }
 0x382   : > { %v1718_v18 = vadd.f32 1.0, %v2957_v32 }
 0x383   : > { %v1783_v56 = vmul.f32 0.5, %v1719_v63  ;;  %v2959_v61 = vpop.eup %2958  ;;  %v2966_v63 = vld [vmem:[%s3565_s21 + $0x30] sm:$0xff] }
 0x384   : > { %v1716_v9 = vadd.f32 1.0, %v2959_v61  ;;  %v1782_v49 = vmul.f32 0.5, %v1718_v18 }
 0x385   : > { %2151 = vmatmul.mubr.bf16.gmra.mxu1 %v1874_v29  ;;  %v1847_v51 = vmul.f32 %v1783_v56, %v4609_v62 }
 0x386   : > { %2158 = vmatprep.mubr.bf16.mxu1 %v1877_v14  ;;  %v1780_v45 = vmul.f32 0.5, %v1716_v9  ;;  %v1846_v31 = vmul.f32 %v1782_v49, %v4601_v22 }
 0x387   : > { %v1879_v20 = vpack.c.bf16 %v1847_v51, %v1845_v13 }
 0x388   : > { %v1844_v62 = vmul.f32 %v1780_v45, %v4586_v28 }
 0x38a   : > { %v1878_v55 = vpack.c.bf16 %v1846_v31, %v1844_v62  ;;  %v2969_v31 = vld [vmem:[%s3565_s21 + $0x48] sm:$0xff] }
 0x38d   : > { %2159 = vmatmul.mubr.bf16.gmra.mxu1 %v1876_v23 }
 0x38e   : > { %2166 = vmatprep.mubr.bf16.mxu1 %v1879_v20 }
 0x395   : > { %2167 = vmatmul.mubr.bf16.gmra.mxu1 %v1878_v55 }
 0x398   : > { %v2488_v50 = vpop.f32.mrf.mxu1 }
 0x39a   : > { %v2489_v36 = vpop.f32.mrf.mxu1 }
 0x39b   : > { %v2490_v38 = vadd.f32 %v2489_v36, %v2488_v50 }
 0x39c   : > { %v2491_v0 = vpop.f32.mrf.mxu1 }
 0x39d   : > { %v2049_v1 = vadd.f32 %v2490_v38, %v4649_v58 }
 0x39e   : > { %v2492_v22 = vpop.f32.mrf.mxu1 }
 0x39f   : > { %v2175_v28 = vadd.f32 %v2960_v57, %v2049_v1  ;;  %v2493_v11 = vadd.f32 %v2492_v22, %v2491_v0  ;;  %v2970_v0 = vld [vmem:[%s3565_s21 + $0x50] sm:$0xff] }
 0x3a1   : > { %2207 = vst [vmem:[%s3565_s21] sm:$0xff] %v2175_v28  ;;  %v2052_v12 = vadd.f32 %v2493_v11, %v4649_v58 }
 0x3a3   : > { %v2176_v3 = vadd.f32 %v2961_v27, %v2052_v12  ;;  %v2971_v12 = vld [vmem:[%s3565_s21 + $0x58] sm:$0xff] }
 0x3a5   : > { %2208 = vst [vmem:[%s3565_s21 + $0x8] sm:$0xff] %v2176_v3  ;;  %v2494_v7 = vpop.f32.mrf.mxu1 }
 0x3a7   : > { %v2495_v16 = vpop.f32.mrf.mxu1 }
 0x3a8   : > { %v2496_v59 = vadd.f32 %v2495_v16, %v2494_v7 }
 0x3a9   : > { %v2497_v53 = vpop.f32.mrf.mxu1 }
 0x3aa   : > { %v2057_v24 = vadd.f32 %v2496_v59, %v4649_v58 }
 0x3ab   : > { %v2498_v46 = vpop.f32.mrf.mxu1 }
 0x3ac   : > { %v2177_v21 = vadd.f32 %v2962_v41, %v2057_v24  ;;  %v2499_v6 = vadd.f32 %v2498_v46, %v2497_v53  ;;  %v2972_v53 = vld [vmem:[%s3565_s21 + $0x60] sm:$0xff] }
 0x3ae   : > { %2209 = vst [vmem:[%s3565_s21 + $0x10] sm:$0xff] %v2177_v21  ;;  %v2060_v26 = vadd.f32 %v2499_v6, %v4649_v58 }
 0x3af   : > { %v2500_v10 = vpop.f32.mrf.mxu1 }
 0x3b0   : > { %v2178_v19 = vadd.f32 %v2963_v17, %v2060_v26  ;;  %v2973_v26 = vld [vmem:[%s3565_s21 + $0x68] sm:$0xff] }
 0x3b1   : > { %v2501_v8 = vpop.f32.mrf.mxu1 }
 0x3b2   : > { %2210 = vst [vmem:[%s3565_s21 + $0x18] sm:$0xff] %v2178_v19  ;;  %v2502_v34 = vadd.f32 %v2501_v8, %v2500_v10 }
 0x3b3   : > { %v2503_v33 = vpop.f32.mrf.mxu1 }
 0x3b4   : > { %v2065_v39 = vadd.f32 %v2502_v34, %v4649_v58 }
 0x3b5   : > { %v2504_v25 = vpop.f32.mrf.mxu1 }
 0x3b6   : > { %v2179_v54 = vadd.f32 %v2964_v37, %v2065_v39  ;;  %v2505_v48 = vadd.f32 %v2504_v25, %v2503_v33  ;;  %v2974_v33 = vld [vmem:[%s3565_s21 + $0x70] sm:$0xff] }
 0x3b8   : > { %2211 = vst [vmem:[%s3565_s21 + $0x20] sm:$0xff] %v2179_v54  ;;  %v2068_v52 = vadd.f32 %v2505_v48, %v4649_v58  ;;  %v2506_v60 = vpop.f32.mrf.mxu1 }
 0x3ba   : > { %v2180_v35 = vadd.f32 %v2965_v47, %v2068_v52  ;;  %v2507_v42 = vpop.f32.mrf.mxu1  ;;  %v2975_v52 = vld [vmem:[%s3565_s21 + $0x78] sm:$0xff] }
 0x3bb   : > { %v2508_v5 = vadd.f32 %v2507_v42, %v2506_v60 }
 0x3bc   : > { %2212 = vst [vmem:[%s3565_s21 + $0x28] sm:$0xff] %v2180_v35  ;;  %v2509_v2 = vpop.f32.mrf.mxu1 }
 0x3bd   : > { %v2073_v43 = vadd.f32 %v2508_v5, %v4649_v58 }
 0x3be   : > { %v2510_v14 = vpop.f32.mrf.mxu1 }
 0x3bf   : > { %v2181_v29 = vadd.f32 %v2966_v63, %v2073_v43  ;;  %v2511_v40 = vadd.f32 %v2510_v14, %v2509_v2  ;;  %v2976_v2 = vld [vmem:[%s3565_s21 + $0x80] sm:$0xff] }
 0x3c1   : > { %2213 = vst [vmem:[%s3565_s21 + $0x30] sm:$0xff] %v2181_v29  ;;  %v2076_v32 = vadd.f32 %v2511_v40, %v4649_v58 }
 0x3c3   : > { %v2182_v56 = vadd.f32 %v2967_v30, %v2076_v32  ;;  %v2977_v32 = vld [vmem:[%s3565_s21 + $0x88] sm:$0xff] }
 0x3c4   : > { %v2512_v15 = vpop.f32.mrf.mxu1 }
 0x3c5   : > { %2214 = vst [vmem:[%s3565_s21 + $0x38] sm:$0xff] %v2182_v56 }
 0x3c6   : > { %v2513_v61 = vpop.f32.mrf.mxu1 }
 0x3c7   : > { %v2514_v51 = vadd.f32 %v2513_v61, %v2512_v15 }
 0x3c8   : > { %v2515_v4 = vpop.f32.mrf.mxu1 }
 0x3c9   : > { %v2081_v18 = vadd.f32 %v2514_v51, %v4649_v58 }
 0x3ca   : > { %v2516_v13 = vpop.f32.mrf.mxu1 }
 0x3cb   : > { %v2183_v9 = vadd.f32 %v2968_v44, %v2081_v18  ;;  %v2517_v20 = vadd.f32 %v2516_v13, %v2515_v4  ;;  %v2978_v4 = vld [vmem:[%s3565_s21 + $0x90] sm:$0xff] }
 0x3cc   : > { %v2518_v23 = vpop.f32.mrf.mxu1 }
 0x3cd   : > { %2215 = vst [vmem:[%s3565_s21 + $0x40] sm:$0xff] %v2183_v9  ;;  %v2084_v49 = vadd.f32 %v2517_v20, %v4649_v58  ;;  %v2979_v9 = vld [vmem:[%s3565_s21 + $0x98] sm:$0xff] }
 0x3ce   : > { %v2519_v45 = vpop.f32.mrf.mxu1 }
 0x3cf   : > { %v2184_v62 = vadd.f32 %v2969_v31, %v2084_v49  ;;  %v2520_v55 = vadd.f32 %v2519_v45, %v2518_v23 }
 0x3d0   : > { %v2521_v50 = vpop.f32.mrf.mxu1 }
 0x3d1   : > { %2216 = vst [vmem:[%s3565_s21 + $0x48] sm:$0xff] %v2184_v62  ;;  %v2089_v36 = vadd.f32 %v2520_v55, %v4649_v58 }
 0x3d2   : > { %v2522_v38 = vpop.f32.mrf.mxu1 }
 0x3d3   : > { %v2185_v1 = vadd.f32 %v2970_v0, %v2089_v36  ;;  %v2523_v22 = vadd.f32 %v2522_v38, %v2521_v50  ;;  %v2980_v50 = vld [vmem:[%s3565_s21 + $0xa0] sm:$0xff] }
 0x3d4   : > { %v2524_v57 = vpop.f32.mrf.mxu1 }
 0x3d5   : > { %2217 = vst [vmem:[%s3565_s21 + $0x50] sm:$0xff] %v2185_v1  ;;  %v2092_v28 = vadd.f32 %v2523_v22, %v4649_v58  ;;  %v2981_v22 = vld [vmem:[%s3565_s21 + $0xa8] sm:$0xff] }
 0x3d6   : > { %v2525_v11 = vpop.f32.mrf.mxu1 }
 0x3d7   : > { %v2186_v27 = vadd.f32 %v2971_v12, %v2092_v28  ;;  %v2526_v3 = vadd.f32 %v2525_v11, %v2524_v57 }
 0x3d8   : > { %v2527_v7 = vpop.f32.mrf.mxu1 }
 0x3d9   : > { %2218 = vst [vmem:[%s3565_s21 + $0x58] sm:$0xff] %v2186_v27  ;;  %v2097_v16 = vadd.f32 %v2526_v3, %v4649_v58 }
 0x3da   : > { %v2528_v59 = vpop.f32.mrf.mxu1 }
 0x3db   : > { %v2187_v24 = vadd.f32 %v2972_v53, %v2097_v16  ;;  %v2529_v46 = vadd.f32 %v2528_v59, %v2527_v7  ;;  %v2982_v7 = vld [vmem:[%s3565_s21 + $0xb0] sm:$0xff] }
 0x3dc   : > { %v2530_v41 = vpop.f32.mrf.mxu1 }
 0x3dd   : > { %2219 = vst [vmem:[%s3565_s21 + $0x60] sm:$0xff] %v2187_v24  ;;  %v2100_v21 = vadd.f32 %v2529_v46, %v4649_v58 }
 0x3de   : > { %v2531_v6 = vpop.f32.mrf.mxu1 }
 0x3df   : > { %v2188_v10 = vadd.f32 %v2973_v26, %v2100_v21  ;;  %v2532_v17 = vadd.f32 %v2531_v6, %v2530_v41  ;;  %v2983_v41 = vld [vmem:[%s3565_s21 + $0xb8] sm:$0xff] }
 0x3e0   : > { %v2533_v19 = vpop.f32.mrf.mxu1 }
 0x3e1   : > { %2220 = vst [vmem:[%s3565_s21 + $0x68] sm:$0xff] %v2188_v10  ;;  %v2105_v8 = vadd.f32 %v2532_v17, %v4649_v58 }
 0x3e2   : > { %v2534_v34 = vpop.f32.mrf.mxu1 }
 0x3e3   : > { %v2189_v39 = vadd.f32 %v2974_v33, %v2105_v8  ;;  %v2535_v25 = vadd.f32 %v2534_v34, %v2533_v19  ;;  %v2984_v19 = vld [vmem:[%s3565_s21 + $0xc0] sm:$0xff] }
 0x3e4   : > { %v2536_v37 = vpop.f32.mrf.mxu1 }
 0x3e5   : > { %2221 = vst [vmem:[%s3565_s21 + $0x70] sm:$0xff] %v2189_v39  ;;  %v2108_v54 = vadd.f32 %v2535_v25, %v4649_v58 }
 0x3e6   : > { %v2537_v48 = vpop.f32.mrf.mxu1 }
 0x3e7   : > { %v2190_v60 = vadd.f32 %v2975_v52, %v2108_v54  ;;  %v2538_v47 = vadd.f32 %v2537_v48, %v2536_v37  ;;  %v2985_v37 = vld [vmem:[%s3565_s21 + $0xc8] sm:$0xff] }
 0x3e8   : > { %v2539_v35 = vpop.f32.mrf.mxu1 }
 0x3e9   : > { %2222 = vst [vmem:[%s3565_s21 + $0x78] sm:$0xff] %v2190_v60  ;;  %v2113_v42 = vadd.f32 %v2538_v47, %v4649_v58 }
 0x3ea   : > { %v2540_v5 = vpop.f32.mrf.mxu1 }
 0x3eb   : > { %v2191_v43 = vadd.f32 %v2976_v2, %v2113_v42  ;;  %v2541_v14 = vadd.f32 %v2540_v5, %v2539_v35  ;;  %v2986_v35 = vld [vmem:[%s3565_s21 + $0xd0] sm:$0xff] }
 0x3ec   : > { %v2542_v63 = vpop.f32.mrf.mxu1 }
 0x3ed   : > { %2223 = vst [vmem:[%s3565_s21 + $0x80] sm:$0xff] %v2191_v43  ;;  %v2116_v29 = vadd.f32 %v2541_v14, %v4649_v58 }
 0x3ee   : > { %v2543_v40 = vpop.f32.mrf.mxu1 }
 0x3ef   : > { %v2192_v30 = vadd.f32 %v2977_v32, %v2116_v29  ;;  %v2544_v56 = vadd.f32 %v2543_v40, %v2542_v63  ;;  %v2987_v63 = vld [vmem:[%s3565_s21 + $0xd8] sm:$0xff] }
 0x3f0   : > { %v2545_v15 = vpop.f32.mrf.mxu1 }
 0x3f1   : > { %2224 = vst [vmem:[%s3565_s21 + $0x88] sm:$0xff] %v2192_v30  ;;  %v2121_v61 = vadd.f32 %v2544_v56, %v4649_v58 }
 0x3f2   : > { %v2546_v51 = vpop.f32.mrf.mxu1 }
 0x3f3   : > { %v2193_v18 = vadd.f32 %v2978_v4, %v2121_v61  ;;  %v2547_v13 = vadd.f32 %v2546_v51, %v2545_v15  ;;  %v2988_v15 = vld [vmem:[%s3565_s21 + $0xe0] sm:$0xff] }
 0x3f5   : > { %2225 = vst [vmem:[%s3565_s21 + $0x90] sm:$0xff] %v2193_v18  ;;  %v2124_v44 = vadd.f32 %v2547_v13, %v4649_v58 }
 0x3f7   : > { %v2194_v20 = vadd.f32 %v2979_v9, %v2124_v44  ;;  %v2989_v44 = vld [vmem:[%s3565_s21 + $0xe8] sm:$0xff] }
 0x3f9   : > { %2226 = vst [vmem:[%s3565_s21 + $0x98] sm:$0xff] %v2194_v20 }
 0x42b   : > { %v2548_v23 = vpop.f32.mrf.mxu1 }
 0x42d   : > { %v2549_v49 = vpop.f32.mrf.mxu1 }
 0x42e   : > { %v2550_v45 = vadd.f32 %v2549_v49, %v2548_v23 }
 0x42f   : > { %v2551_v31 = vpop.f32.mrf.mxu1 }
 0x430   : > { %v2129_v62 = vadd.f32 %v2550_v45, %v4649_v58 }
 0x431   : > { %v2552_v55 = vpop.f32.mrf.mxu1 }
 0x432   : > { %v2195_v36 = vadd.f32 %v2980_v50, %v2129_v62  ;;  %v2553_v38 = vadd.f32 %v2552_v55, %v2551_v31  ;;  %v2990_v31 = vld [vmem:[%s3565_s21 + $0xf0] sm:$0xff] }
 0x434   : > { %2227 = vst [vmem:[%s3565_s21 + $0xa0] sm:$0xff] %v2195_v36  ;;  %v2132_v0 = vadd.f32 %v2553_v38, %v4649_v58  ;;  %v2991_v36 = vld [vmem:[%s3565_s21 + $0xf8] sm:$0xff] }
 0x435   : > { %v2554_v1 = vpop.f32.mrf.mxu1 }
 0x436   : > { %v2196_v57 = vadd.f32 %v2981_v22, %v2132_v0 }
 0x437   : > { %v2555_v28 = vpop.f32.mrf.mxu1 }
 0x438   : > { %2228 = vst [vmem:[%s3565_s21 + $0xa8] sm:$0xff] %v2196_v57  ;;  %v2556_v11 = vadd.f32 %v2555_v28, %v2554_v1 }
 0x439   : > { %v2557_v12 = vpop.f32.mrf.mxu1 }
 0x43a   : > { %v2137_v27 = vadd.f32 %v2556_v11, %v4649_v58 }
 0x43b   : > { %v2558_v3 = vpop.f32.mrf.mxu1 }
 0x43c   : > { %v2197_v16 = vadd.f32 %v2982_v7, %v2137_v27  ;;  %v2559_v59 = vadd.f32 %v2558_v3, %v2557_v12 }
 0x43d   : > { %v2560_v53 = vpop.f32.mrf.mxu1 }
 0x43e   : > { %2229 = vst [vmem:[%s3565_s21 + $0xb0] sm:$0xff] %v2197_v16  ;;  %v2140_v24 = vadd.f32 %v2559_v59, %v4649_v58 }
 0x43f   : > { %v2561_v46 = vpop.f32.mrf.mxu1 }
 0x440   : > { %v2198_v21 = vadd.f32 %v2983_v41, %v2140_v24  ;;  %v2562_v6 = vadd.f32 %v2561_v46, %v2560_v53 }
 0x441   : > { %v2563_v26 = vpop.f32.mrf.mxu1 }
 0x442   : > { %2230 = vst [vmem:[%s3565_s21 + $0xb8] sm:$0xff] %v2198_v21  ;;  %v2145_v10 = vadd.f32 %v2562_v6, %v4649_v58 }
 0x443   : > { %v2564_v17 = vpop.f32.mrf.mxu1 }
 0x444   : > { %v2199_v8 = vadd.f32 %v2984_v19, %v2145_v10  ;;  %v2565_v34 = vadd.f32 %v2564_v17, %v2563_v26 }
 0x445   : > { %v2566_v33 = vpop.f32.mrf.mxu1 }
 0x446   : > { %2231 = vst [vmem:[%s3565_s21 + $0xc0] sm:$0xff] %v2199_v8  ;;  %v2148_v39 = vadd.f32 %v2565_v34, %v4649_v58 }
 0x447   : > { %v2567_v25 = vpop.f32.mrf.mxu1 }
 0x448   : > { %v2200_v54 = vadd.f32 %v2985_v37, %v2148_v39  ;;  %v2568_v48 = vadd.f32 %v2567_v25, %v2566_v33 }
 0x449   : > { %v2569_v52 = vpop.f32.mrf.mxu1 }
 0x44a   : > { %2232 = vst [vmem:[%s3565_s21 + $0xc8] sm:$0xff] %v2200_v54  ;;  %v2153_v60 = vadd.f32 %v2568_v48, %v4649_v58 }
 0x44b   : > { %v2570_v47 = vpop.f32.mrf.mxu1 }
 0x44c   : > { %v2201_v42 = vadd.f32 %v2986_v35, %v2153_v60  ;;  %v2571_v5 = vadd.f32 %v2570_v47, %v2569_v52 }
 0x44d   : > { %v2572_v2 = vpop.f32.mrf.mxu1 }
 0x44e   : > { %2233 = vst [vmem:[%s3565_s21 + $0xd0] sm:$0xff] %v2201_v42  ;;  %v2156_v43 = vadd.f32 %v2571_v5, %v4649_v58 }
 0x44f   : > { %v2573_v14 = vpop.f32.mrf.mxu1 }
 0x450   : > { %v2202_v29 = vadd.f32 %v2987_v63, %v2156_v43  ;;  %v2574_v40 = vadd.f32 %v2573_v14, %v2572_v2 }
 0x451   : > { %v2575_v32 = vpop.f32.mrf.mxu1 }
 0x452   : > { %2234 = vst [vmem:[%s3565_s21 + $0xd8] sm:$0xff] %v2202_v29  ;;  %v2161_v30 = vadd.f32 %v2574_v40, %v4649_v58 }
 0x453   : > { %v2576_v56 = vpop.f32.mrf.mxu1 }
 0x454   : > { %v2203_v61 = vadd.f32 %v2988_v15, %v2161_v30  ;;  %v2577_v51 = vadd.f32 %v2576_v56, %v2575_v32 }
 0x455   : > { %v2578_v4 = vpop.f32.mrf.mxu1 }
 0x456   : > { %2235 = vst [vmem:[%s3565_s21 + $0xe0] sm:$0xff] %v2203_v61  ;;  %v2164_v18 = vadd.f32 %v2577_v51, %v4649_v58 }
 0x457   : > { %v2579_v13 = vpop.f32.mrf.mxu1 }
 0x458   : > { %v2204_v9 = vadd.f32 %v2989_v44, %v2164_v18  ;;  %v2580_v20 = vadd.f32 %v2579_v13, %v2578_v4 }
 0x459   : > { %v2581_v23 = vpop.f32.mrf.mxu1 }
 0x45a   : > { %2236 = vst [vmem:[%s3565_s21 + $0xe8] sm:$0xff] %v2204_v9  ;;  %v2169_v49 = vadd.f32 %v2580_v20, %v4649_v58 }
 0x45b   : > { %v2582_v45 = vpop.f32.mrf.mxu1 }
 0x45c   : > { %v2205_v62 = vadd.f32 %v2990_v31, %v2169_v49  ;;  %v2583_v55 = vadd.f32 %v2582_v45, %v2581_v23 }
 0x45e   : > { %2237 = vst [vmem:[%s3565_s21 + $0xf0] sm:$0xff] %v2205_v62  ;;  %v2172_v50 = vadd.f32 %v2583_v55, %v4649_v58 }
 0x460   : > { %v2206_v38 = vadd.f32 %v2991_v36, %v2172_v50 }
 0x462   : > { %2238 = vst [vmem:[%s3565_s21 + $0xf8] sm:$0xff] %v2206_v38 }
 0x463   : > { %3141 = shalt.err (!%p3138_p11)
}
 0x464   : > { %s3142_s21 = scalar_lea.hbm %s4750_s12, 4096  ;;  %s3146_s13 = scalar_lea.hbm %s4883_s23, 8192 }
 0x465   : > { %p3143_p13 = scmp.ne.s32.totalorder %s4750_s12, %s3142_s21  ;;  %p3147_p7 = scmp.lt.s32.totalorder %s4750_s12, %s4883_s23 }
 0x466   : > { %p3148_p10 = scmp.lt.s32.totalorder %s3146_s13, %s3142_s21 }
 0x467   : > { %p3144_p2 = pnand %p3143_p13, %p4884_p0 }
 0x468   : > { %p3149_p4 = por %p3148_p10, %p3147_p7 }
 0x469   : > { %p3145_p8 = pneg %p3144_p2 }
 0x46b   : > { %p3150_p6 = pnand %p3149_p4, %p3145_p8 }
 0x46d   : > { %3153 = shalt.err (!%p3150_p6)
}
 0x46e   : > { %s3273_s17 = smov 128   ;;  %s3274_s16 = smov 8  }
 0x46f   : > { %2598 = dma.vmem_to_hbm [thread:$0]  (%p4884_p0), %s4752_s8, 4096, %s4750_s12, %s2240_s22, %s3273_s17, %s3273_s17, %s3274_s16  }
 0x470 PF: > { %s4885_s7 = sld [smem:[#allocation16_spill]]  ;;  %p2626_p3 = scmp.ge.s32.totalorder %s3256_s11, 2 }
 0x471   : > { %s4886_s20 = sld [smem:[#allocation20_spill]] }
 0x476   : > { %s2268_s14 = sand.u32 1, %s4885_s7  }
 0x477   : > { %p4887_p12 = scmp.ne.s32.totalorder %s4886_s20, 0  ;;  %s2269_s27 = scalar_lea.sflag [#allocation4], %s2268_s14 }
 0x479   : > { %p2618_p5 = pnand %p2626_p3, %p4887_p12 }
 0x47b   : > { %p2619_p9 = pneg %p2618_p5 }
 0x47d   : > { %3211 = dma.done.wait (%p2619_p9), %s2269_s27, 4096  }
 0x47e   : > { %3213 = vsyncadd (%p2619_p9), %s2269_s27, 4294963200  ;;  %s27_s11 = sadd.s32 1, %s3256_s11   ;;  %s4888_s5 = sld [smem:[#allocation21_spill]] }
 0x47f   : > { %p24_p1 = scmp.ge.s32.totalorder %s27_s11, 8   ;;  %s4889_s1 = sld [smem:[#allocation22_spill]] }
 0x480   : > { %s4890_s24 = smov %s3220_s25  ;;  %s4891_s25 = smov %s3224_s26 }
 0x481   : > { %s4892_s26 = smov %s3442_s18  ;;  %s4893_s27 = smov %s3232_s28 }
 0x482   : > { %s4894_s28 = smov %s3236_s29  ;;  %s4895_s29 = smov %s3518_s3 }
 0x483   : > { %s4896_s30 = smov %s3248_s9  ;;  %s4897_s8 = smov %s3252_s10 }
 0x484   : > { %s4898_s9 = smov %s4888_s5  ;;  %26 = sbr.rel (!%p24_p1) target bundleno = 20 (0x14), region = 133 }
 0x485   : > { %s4899_s10 = smov %s4889_s1 }
 0x489   :  { %2274 = vsyncpa [#allocation3], 1 }
 0x48a   :  { %2276 = vsyncpa [#allocation3 + $0x1], 1 }
 0x48b   :  { %2277 = vsyncpa [#allocation6], 1 }
 0x48c   :  { %2278 = vsyncpa [#allocation9], 1 }
 0x48d   :  { %2280 = vsyncpa [#allocation9 + $0x1], 1 }
 0x48e   :  { %2281 = vsyncpa [#allocation4], 1 }
 0x48f   :  { %2283 = vsyncpa [#allocation4 + $0x1], 1 }

</bundles_post_ra>
